<compile_context>
chip_gen: v5e
topology: v5e:2x2
jax: 0.10.0
libtpu: 0.0.40
codegen_flags: <defaults>
</compile_context>

<pallas_src>
import math
from functools import partial

import jax
import jax.numpy as jnp
from jax.experimental import pallas as pl
from jax.experimental.pallas import tpu as pltpu

# ---- synthetic "BERT" config (stand-in for AutoConfig/AutoModel) ------------
VOCAB = 100
MAX_POS = 64
TYPE_VOCAB = 2
HIDDEN = 32
NUM_LAYERS = 2
NUM_HEADS = 2
HEAD_DIM = HIDDEN // NUM_HEADS
INTERMEDIATE = 64
LN_EPS = 1e-12
POOLING = "mean"      # matches the 'mean' branch of _pool_output
BATCH = 2
SEQ = 8
T_TEMPERATURE = 0.05  # args.t  (log_inv_t = log(1/t)); unused in forward

# ---- padded (lane-dense) dims ------------------------------------------------
HP = 128                       # hidden padded to full 128-lane width
HDP = 128                      # per-head dim padded to 128 lanes
IP = 128                       # FFN intermediate padded to 128 lanes
QKVW = 3 * NUM_HEADS * HDP     # fused QKV output width (q_h0|q_h1|k_h0|k_h1|v_h0|v_h1)
CTXW = NUM_HEADS * HDP         # concatenated context width


# ----------------------------- Pallas kernel --------------------------------
def bert_encode_pool_kernel(
    x_ref, mask_q_ref, mask_k_ref, embg_ref, embb_ref,
    wqkv_ref, bqkv_ref, wo_ref, bo_ref, ln1g_ref, ln1b_ref,
    wi_ref, bi_ref, wo2_ref, bo2_ref, ln2g_ref, ln2b_ref,
    out_ref, *, pooling):
    # One batch element per grid step.
    h = x_ref[0]                     # (S, HP) f32 summed embeddings (lanes >= HIDDEN are 0)
    mq = mask_q_ref[0]               # (S, 1)  f32 mask for pooling
    mk = mask_k_ref[0]               # (1, S)  f32 mask over key positions

    # lane mask selecting the real hidden lanes (padded gamma/beta are 0 anyway)
    lane_ids = jax.lax.broadcasted_iota(jnp.int32, (1, HP), 1)
    lane_mask = (lane_ids < HIDDEN).astype(jnp.float32)          # (1, HP)
    inv_h = 1.0 / HIDDEN

    def layernorm(v, g, b):          # f32 stats over the real HIDDEN lanes only
        mu = jnp.sum(v * lane_mask, axis=-1, keepdims=True) * inv_h
        d = (v - mu) * lane_mask
        var = jnp.sum(d * d, axis=-1, keepdims=True) * inv_h
        return d * jax.lax.rsqrt(var + LN_EPS) * g + b

    def mm(a, w):                    # bf16 MXU matmul, f32 accumulate
        return jnp.dot(a.astype(jnp.bfloat16), w.astype(jnp.bfloat16),
                       preferred_element_type=jnp.float32)

    def mmt(a, b):                   # a @ b.T on the MXU (bf16 in, f32 acc)
        return jnp.einsum('qd,kd->qk',
                          a.astype(jnp.bfloat16), b.astype(jnp.bfloat16),
                          preferred_element_type=jnp.float32)

    # embedding layernorm
    h = layernorm(h, embg_ref[...], embb_ref[...])

    attn_bias = (1.0 - mk) * (-10000.0)          # (1, S) broadcasts over (S, S) scores
    scale = 1.0 / math.sqrt(HEAD_DIM)

    for l in range(NUM_LAYERS):                  # static unrolled layer loop (L=2)
        # fused QKV projection: one matmul for q/k/v of all heads
        qkv = mm(h, wqkv_ref[l]) + bqkv_ref[l]   # (S, QKVW)

        ctx_heads = []
        for hd in range(NUM_HEADS):              # static; every head block is 128-lane aligned
            q_h = qkv[:, hd * HDP:(hd + 1) * HDP]
            k_h = qkv[:, (NUM_HEADS + hd) * HDP:(NUM_HEADS + hd + 1) * HDP]
            v_h = qkv[:, (2 * NUM_HEADS + hd) * HDP:(2 * NUM_HEADS + hd + 1) * HDP]
            scores = mmt(q_h, k_h) * scale + attn_bias          # (S, S) f32
            m = jnp.max(scores, axis=-1, keepdims=True)
            p = jnp.exp(scores - m)
            p = p * pl.reciprocal(jnp.sum(p, axis=-1, keepdims=True), approx=True)
            ctx_heads.append(mm(p, v_h))                        # (S, HDP)
        ctx = jnp.concatenate(ctx_heads, axis=-1)               # (S, CTXW) lane-block concat

        attn_out = mm(ctx, wo_ref[l]) + bo_ref[l]               # (S, HP)
        h = layernorm(h + attn_out, ln1g_ref[l], ln1b_ref[l])

        inter = mm(h, wi_ref[l]) + bi_ref[l]                    # (S, IP)
        # TODO(synk): HF BERT uses exact erf-GELU; tanh approximation used here.
        inter = jax.nn.gelu(inter, approximate=True)
        ffn_out = mm(inter, wo2_ref[l]) + bo2_ref[l]            # (S, HP)
        h = layernorm(h + ffn_out, ln2g_ref[l], ln2b_ref[l])

    # ---- _pool_output -------------------------------------------------------
    if pooling == "cls":
        pooled = h[0:1, :]
    elif pooling == "mean":
        sum_emb = jnp.sum(h * mq, axis=0, keepdims=True)                    # (1, HP)
        sum_mask = jnp.maximum(jnp.sum(mq, axis=0, keepdims=True), 1e-4)    # (1, 1)
        pooled = sum_emb * pl.reciprocal(sum_mask, approx=True)
    else:  # 'max'
        masked = jnp.where(mq == 0.0, -10000.0, h)
        pooled = jnp.max(masked, axis=0, keepdims=True)

    # F.normalize(dim=1): x / max(||x||_2, eps)  ->  x * rsqrt(max(||x||^2, eps^2))
    nrm2 = jnp.sum(pooled * pooled * lane_mask, axis=-1, keepdims=True)
    pooled = pooled * lane_mask * jax.lax.rsqrt(jnp.maximum(nrm2, 1e-24))

    out_ref[...] = pooled.reshape(1, 1, HP)      # lane-dense (full 128-lane) store


# --------------------- wrapper-side parameter preparation --------------------
def _pad2(a, r, c):
    return jnp.pad(a, ((0, r - a.shape[0]), (0, c - a.shape[1])))


def _pad1(a, c):
    return jnp.pad(a, ((0, c - a.shape[0]),))


def prepare_encoder_params(p):
    """Pad to 128-lane widths, fuse QKV per-head blocks, cast matmul weights to bf16."""
    L, H, HD, NH = NUM_LAYERS, HIDDEN, HEAD_DIM, NUM_HEADS

    wqkv_layers, bqkv_layers, wo_layers = [], [], []
    for l in range(L):
        blocks_w, blocks_b = [], []
        for w, b in ((p["wq"][l], p["bq"][l, 0]),
                     (p["wk"][l], p["bk"][l, 0]),
                     (p["wv"][l], p["bv"][l, 0])):
            for hd in range(NH):
                sl = slice(hd * HD, (hd + 1) * HD)
                blocks_w.append(_pad2(w[:, sl], HP, HDP))       # (HP, HDP)
                blocks_b.append(_pad1(b[sl], HDP))              # (HDP,)
        wqkv_layers.append(jnp.concatenate(blocks_w, axis=1))   # (HP, QKVW)
        bqkv_layers.append(jnp.concatenate(blocks_b, axis=0))   # (QKVW,)

        rows = [_pad2(p["wo"][l][hd * HD:(hd + 1) * HD, :], HDP, HP) for hd in range(NH)]
        wo_layers.append(jnp.concatenate(rows, axis=0))         # (CTXW, HP)

    pad_h = ((0, 0), (0, 0), (0, HP - H))
    pad_i = ((0, 0), (0, 0), (0, IP - INTERMEDIATE))
    return {
        # raw embedding tables (gathers stay in plain JAX)
        "word_emb": p["word_emb"], "pos_emb": p["pos_emb"], "type_emb": p["type_emb"],
        # padded layernorm / bias params (f32; padded gamma/beta are zero)
        "emb_ln_g": jnp.pad(p["emb_ln_g"], ((0, 0), (0, HP - H))),
        "emb_ln_b": jnp.pad(p["emb_ln_b"], ((0, 0), (0, HP - H))),
        "bqkv": jnp.stack(bqkv_layers)[:, None, :],                         # (L,1,QKVW)
        "bo": jnp.pad(p["bo"], pad_h),
        "ln1_g": jnp.pad(p["ln1_g"], pad_h), "ln1_b": jnp.pad(p["ln1_b"], pad_h),
        "bi": jnp.pad(p["bi"], pad_i),
        "bo2": jnp.pad(p["bo2"], pad_h),
        "ln2_g": jnp.pad(p["ln2_g"], pad_h), "ln2_b": jnp.pad(p["ln2_b"], pad_h),
        # fused / padded matmul weights in bf16 (f32 accumulation in kernel)
        "wqkv": jnp.stack(wqkv_layers).astype(jnp.bfloat16),                # (L,HP,QKVW)
        "wo": jnp.stack(wo_layers).astype(jnp.bfloat16),                    # (L,CTXW,HP)
        "wi": jnp.pad(p["wi"], ((0, 0), (0, HP - H), (0, IP - INTERMEDIATE))
                      ).astype(jnp.bfloat16),                               # (L,HP,IP)
        "wo2": jnp.pad(p["wo2"], ((0, 0), (0, IP - INTERMEDIATE), (0, HP - H))
                       ).astype(jnp.bfloat16),                              # (L,IP,HP)
    }


# ------------------------------ encode wrapper --------------------------------
def bert_encode(enc, token_ids, mask, token_type_ids, pooling=POOLING):
    """Equivalent of CustomBertModel._encode for one synthetic BERT encoder."""
    B, S = token_ids.shape
    pos_ids = jnp.arange(S, dtype=jnp.int32)
    # embedding gathers stay in plain JAX (glue); pad hidden to 128 lanes
    x = (enc["word_emb"][token_ids]
         + enc["pos_emb"][pos_ids][None, :, :]
         + enc["type_emb"][token_type_ids]).astype(jnp.float32)
    x = jnp.pad(x, ((0, 0), (0, 0), (0, HP - HIDDEN)))            # (B, S, HP)
    mask_f = mask.astype(jnp.float32)
    mask_q = mask_f[:, :, None]                                   # (B, S, 1)
    mask_k = mask_f[:, None, :]                                   # (B, 1, S)

    L = NUM_LAYERS

    def full(shape):  # whole-array block, constant index map -> stays VMEM-resident
        return pl.BlockSpec(shape, lambda b, _n=len(shape): (0,) * _n)

    in_specs = [
        pl.BlockSpec((1, S, HP), lambda b: (b, 0, 0)),            # x
        pl.BlockSpec((1, S, 1), lambda b: (b, 0, 0)),             # mask_q
        pl.BlockSpec((1, 1, S), lambda b: (b, 0, 0)),             # mask_k
        full((1, HP)), full((1, HP)),                             # emb LN gamma/beta
        full((L, HP, QKVW)), full((L, 1, QKVW)),                  # fused QKV
        full((L, CTXW, HP)), full((L, 1, HP)),                    # attn output proj
        full((L, 1, HP)), full((L, 1, HP)),                       # LN1
        full((L, HP, IP)), full((L, 1, IP)),                      # FFN in
        full((L, IP, HP)), full((L, 1, HP)),                      # FFN out
        full((L, 1, HP)), full((L, 1, HP)),                       # LN2
    ]

    out = pl.pallas_call(
        partial(bert_encode_pool_kernel, pooling=pooling),
        grid=(B,),
        out_shape=jax.ShapeDtypeStruct((B, 1, HP), jnp.float32),
        in_specs=in_specs,
        out_specs=pl.BlockSpec((1, 1, HP), lambda b: (b, 0, 0)),
        compiler_params=pltpu.CompilerParams(
            dimension_semantics=("parallel",),
            vmem_limit_bytes=8 << 20),
    )(x, mask_q, mask_k,
      enc["emb_ln_g"], enc["emb_ln_b"],
      enc["wqkv"], enc["bqkv"], enc["wo"], enc["bo"],
      enc["ln1_g"], enc["ln1_b"],
      enc["wi"], enc["bi"], enc["wo2"], enc["bo2"],
      enc["ln2_g"], enc["ln2_b"])
    return out[:, 0, :HIDDEN]                                     # un-pad lanes in JAX


def custom_bert_forward(hr_enc, tail_enc, batch):
    """Mirrors CustomBertModel.forward (no negatives / no only_* shortcuts).
    hr and hrp use the same encoder -> merged into a single pallas_call."""
    nb = batch["hr_token_ids"].shape[0]
    ids = jnp.concatenate([batch["hr_token_ids"], batch["hrp_token_ids"]], axis=0)
    msk = jnp.concatenate([batch["hr_mask"], batch["hrp_mask"]], axis=0)
    tti = jnp.concatenate([batch["hr_token_type_ids"], batch["hrp_token_type_ids"]], axis=0)
    hr_hp = bert_encode(hr_enc, ids, msk, tti)
    hr_vector, hp_vector = hr_hp[:nb], hr_hp[nb:]
    tail_vector = bert_encode(tail_enc, batch["tail_token_ids"],
                              batch["tail_mask"], batch["tail_token_type_ids"])
    return {"hr_vector": hr_vector, "tail_vector": tail_vector,
            "hp_vector": hp_vector, "negative_vector": None}


# --------------------------- parameter init ----------------------------------
def init_bert_params(key):
    ks = jax.random.split(key, 24)
    n = lambda k, shape, s=0.02: (s * jax.random.normal(k, shape)).astype(jnp.float32)
    L, H, I = NUM_LAYERS, HIDDEN, INTERMEDIATE
    return {
        "word_emb": n(ks[0], (VOCAB, H)),
        "pos_emb":  n(ks[1], (MAX_POS, H)),
        "type_emb": n(ks[2], (TYPE_VOCAB, H)),
        "emb_ln_g": jnp.ones((1, H), jnp.float32),
        "emb_ln_b": jnp.zeros((1, H), jnp.float32),
        "wq": n(ks[3], (L, H, H)), "bq": jnp.zeros((L, 1, H), jnp.float32),
        "wk": n(ks[4], (L, H, H)), "bk": jnp.zeros((L, 1, H), jnp.float32),
        "wv": n(ks[5], (L, H, H)), "bv": jnp.zeros((L, 1, H), jnp.float32),
        "wo": n(ks[6], (L, H, H)), "bo": jnp.zeros((L, 1, H), jnp.float32),
        "ln1_g": jnp.ones((L, 1, H), jnp.float32),
        "ln1_b": jnp.zeros((L, 1, H), jnp.float32),
        "wi":  n(ks[7], (L, H, I)), "bi":  jnp.zeros((L, 1, I), jnp.float32),
        "wo2": n(ks[8], (L, I, H)), "bo2": jnp.zeros((L, 1, H), jnp.float32),
        "ln2_g": jnp.ones((L, 1, H), jnp.float32),
        "ln2_b": jnp.zeros((L, 1, H), jnp.float32),
    }


if __name__ == "__main__":
    root = jax.random.PRNGKey(0)
    k_params, k_hr, k_hrp, k_tail, k_pre = jax.random.split(root, 5)

    # hr_bert params; tail_bert = deepcopy(hr_bert) -> identical copy
    hr_params = init_bert_params(k_params)
    tail_params = jax.tree_util.tree_map(lambda a: a, hr_params)
    hr_enc = prepare_encoder_params(hr_params)
    tail_enc = prepare_encoder_params(tail_params)

    # buffers defined in __init__ (unused by forward, kept for fidelity)
    log_inv_t = jnp.log(jnp.array(1.0 / T_TEMPERATURE, jnp.float32))
    pre_vec = jax.random.normal(k_pre, (BATCH, HIDDEN)).astype(jnp.float32)
    pre_batch_vectors = pre_vec / jnp.maximum(
        jnp.sqrt(jnp.sum(pre_vec * pre_vec, axis=1, keepdims=True)), 1e-12)

    def make_inputs(key):
        ids = jax.random.randint(key, (BATCH, SEQ), 0, VOCAB, dtype=jnp.int32)
        mask = jnp.ones((BATCH, SEQ), jnp.int32).at[1, -2:].set(0)  # some padding
        ttids = jnp.zeros((BATCH, SEQ), jnp.int32)
        return ids, mask, ttids

    hr_ids, hr_mask, hr_tt = make_inputs(k_hr)
    hrp_ids, hrp_mask, hrp_tt = make_inputs(k_hrp)
    tail_ids, tail_mask, tail_tt = make_inputs(k_tail)

    batch = {
        "hr_token_ids": hr_ids, "hr_mask": hr_mask, "hr_token_type_ids": hr_tt,
        "hrp_token_ids": hrp_ids, "hrp_mask": hrp_mask, "hrp_token_type_ids": hrp_tt,
        "tail_token_ids": tail_ids, "tail_mask": tail_mask, "tail_token_type_ids": tail_tt,
    }

    out = custom_bert_forward(hr_enc, tail_enc, batch)
    jax.block_until_ready((out["hr_vector"], out["hp_vector"], out["tail_vector"]))

    assert out["hr_vector"].shape == (BATCH, HIDDEN)
    assert out["hp_vector"].shape == (BATCH, HIDDEN)
    assert out["tail_vector"].shape == (BATCH, HIDDEN)
    # outputs are L2-normalized
    assert bool(jnp.allclose(jnp.linalg.norm(out["hr_vector"], axis=1), 1.0, atol=1e-4))
    assert bool(jnp.allclose(jnp.linalg.norm(out["tail_vector"], axis=1), 1.0, atol=1e-4))
    print("KERNEL_OK")
</pallas_src>

<mosaic_0001>
module attributes {stable_mosaic.version = 11 : i64} {
  func.func @bert_encode_pool_kernel(%arg0: i32, %arg1: memref<1x8x128xf32, #tpu.memory_space<vmem>>, %arg2: memref<1x8x1xf32, #tpu.memory_space<vmem>>, %arg3: memref<1x1x8xf32, #tpu.memory_space<vmem>>, %arg4: memref<1x128xf32, #tpu.memory_space<vmem>>, %arg5: memref<1x128xf32, #tpu.memory_space<vmem>>, %arg6: memref<2x128x768xbf16, #tpu.memory_space<vmem>>, %arg7: memref<2x1x768xf32, #tpu.memory_space<vmem>>, %arg8: memref<2x256x128xbf16, #tpu.memory_space<vmem>>, %arg9: memref<2x1x128xf32, #tpu.memory_space<vmem>>, %arg10: memref<2x1x128xf32, #tpu.memory_space<vmem>>, %arg11: memref<2x1x128xf32, #tpu.memory_space<vmem>>, %arg12: memref<2x128x128xbf16, #tpu.memory_space<vmem>>, %arg13: memref<2x1x128xf32, #tpu.memory_space<vmem>>, %arg14: memref<2x128x128xbf16, #tpu.memory_space<vmem>>, %arg15: memref<2x1x128xf32, #tpu.memory_space<vmem>>, %arg16: memref<2x1x128xf32, #tpu.memory_space<vmem>>, %arg17: memref<2x1x128xf32, #tpu.memory_space<vmem>>, %arg18: memref<1x1x128xf32, #tpu.memory_space<vmem>>) attributes {dimension_semantics = [#tpu.dimension_semantics<parallel>], iteration_bounds = array<i64: 4>, scalar_prefetch = 0 : i64, scratch_operands = 0 : i64, tpu.core_type = #tpu.core_type<tc>, window_params = [{transform_indices = @transform_0, window_bounds = array<i64: 1, 8, 128>}, {transform_indices = @transform_1, window_bounds = array<i64: 1, 8, 1>}, {transform_indices = @transform_2, window_bounds = array<i64: 1, 1, 8>}, {pipeline_mode = #tpu.pipeline_mode<synchronous>, transform_indices = @transform_3, window_bounds = array<i64: 1, 128>}, {pipeline_mode = #tpu.pipeline_mode<synchronous>, transform_indices = @transform_4, window_bounds = array<i64: 1, 128>}, {pipeline_mode = #tpu.pipeline_mode<synchronous>, transform_indices = @transform_5, window_bounds = array<i64: 2, 128, 768>}, {pipeline_mode = #tpu.pipeline_mode<synchronous>, transform_indices = @transform_6, window_bounds = array<i64: 2, 1, 768>}, {pipeline_mode = #tpu.pipeline_mode<synchronous>, transform_indices = @transform_7, window_bounds = array<i64: 2, 256, 128>}, {pipeline_mode = #tpu.pipeline_mode<synchronous>, transform_indices = @transform_8, window_bounds = array<i64: 2, 1, 128>}, {pipeline_mode = #tpu.pipeline_mode<synchronous>, transform_indices = @transform_9, window_bounds = array<i64: 2, 1, 128>}, {pipeline_mode = #tpu.pipeline_mode<synchronous>, transform_indices = @transform_10, window_bounds = array<i64: 2, 1, 128>}, {pipeline_mode = #tpu.pipeline_mode<synchronous>, transform_indices = @transform_11, window_bounds = array<i64: 2, 128, 128>}, {pipeline_mode = #tpu.pipeline_mode<synchronous>, transform_indices = @transform_12, window_bounds = array<i64: 2, 1, 128>}, {pipeline_mode = #tpu.pipeline_mode<synchronous>, transform_indices = @transform_13, window_bounds = array<i64: 2, 128, 128>}, {pipeline_mode = #tpu.pipeline_mode<synchronous>, transform_indices = @transform_14, window_bounds = array<i64: 2, 1, 128>}, {pipeline_mode = #tpu.pipeline_mode<synchronous>, transform_indices = @transform_15, window_bounds = array<i64: 2, 1, 128>}, {pipeline_mode = #tpu.pipeline_mode<synchronous>, transform_indices = @transform_16, window_bounds = array<i64: 2, 1, 128>}, {transform_indices = @transform_17, window_bounds = array<i64: 1, 1, 128>}]} {
    %c0 = arith.constant 0 : index
    %c0_0 = arith.constant 0 : index
    %c0_1 = arith.constant 0 : index
    %0 = vector.load %arg1[%c0, %c0_0, %c0_1] : memref<1x8x128xf32, #tpu.memory_space<vmem>>, vector<1x8x128xf32>
    %1 = vector.shape_cast %0 : vector<1x8x128xf32> to vector<8x128xf32>
    %c0_2 = arith.constant 0 : index
    %c0_3 = arith.constant 0 : index
    %c0_4 = arith.constant 0 : index
    %2 = vector.load %arg2[%c0_2, %c0_3, %c0_4] : memref<1x8x1xf32, #tpu.memory_space<vmem>>, vector<1x8x1xf32>
    %3 = vector.shape_cast %2 : vector<1x8x1xf32> to vector<8x1xf32>
    %c0_5 = arith.constant 0 : index
    %c0_6 = arith.constant 0 : index
    %c0_7 = arith.constant 0 : index
    %4 = vector.load %arg3[%c0_5, %c0_6, %c0_7] : memref<1x1x8xf32, #tpu.memory_space<vmem>>, vector<1x1x8xf32>
    %5 = vector.shape_cast %4 : vector<1x1x8xf32> to vector<1x8xf32>
    %6 = tpu.iota {dimensions = array<i32: 1>} : vector<1x128xi32>
    %c32_i32 = arith.constant 32 : i32
    %7 = vector.broadcast %c32_i32 : i32 to vector<1x128xi32>
    %8 = arith.cmpi slt, %6, %7 : vector<1x128xi32>
    %9 = arith.extui %8 : vector<1x128xi1> to vector<1x128xi32>
    %10 = arith.sitofp %9 : vector<1x128xi32> to vector<1x128xf32>
    %c0_8 = arith.constant 0 : index
    %c0_9 = arith.constant 0 : index
    %11 = vector.load %arg4[%c0_8, %c0_9] : memref<1x128xf32, #tpu.memory_space<vmem>>, vector<1x128xf32>
    %c0_10 = arith.constant 0 : index
    %c0_11 = arith.constant 0 : index
    %12 = vector.load %arg5[%c0_10, %c0_11] : memref<1x128xf32, #tpu.memory_space<vmem>>, vector<1x128xf32>
    %13 = vector.broadcast %10 : vector<1x128xf32> to vector<8x128xf32>
    %14 = arith.mulf %1, %13 : vector<8x128xf32>
    %cst = arith.constant dense<0.000000e+00> : vector<8xf32>
    %15 = vector.multi_reduction <add>, %14, %cst [1] : vector<8x128xf32> to vector<8xf32>
    %16 = vector.shape_cast %15 : vector<8xf32> to vector<8x1xf32>
    %cst_12 = arith.constant 3.125000e-02 : f32
    %17 = vector.broadcast %cst_12 : f32 to vector<8x1xf32>
    %18 = arith.mulf %16, %17 : vector<8x1xf32>
    %19 = vector.broadcast %18 : vector<8x1xf32> to vector<8x128xf32>
    %20 = arith.subf %1, %19 : vector<8x128xf32>
    %21 = vector.broadcast %10 : vector<1x128xf32> to vector<8x128xf32>
    %22 = arith.mulf %20, %21 : vector<8x128xf32>
    %23 = arith.mulf %22, %22 : vector<8x128xf32>
    %cst_13 = arith.constant dense<0.000000e+00> : vector<8xf32>
    %24 = vector.multi_reduction <add>, %23, %cst_13 [1] : vector<8x128xf32> to vector<8xf32>
    %25 = vector.shape_cast %24 : vector<8xf32> to vector<8x1xf32>
    %cst_14 = arith.constant 3.125000e-02 : f32
    %26 = vector.broadcast %cst_14 : f32 to vector<8x1xf32>
    %27 = arith.mulf %25, %26 : vector<8x1xf32>
    %cst_15 = arith.constant 9.99999996E-13 : f32
    %28 = vector.broadcast %cst_15 : f32 to vector<8x1xf32>
    %29 = arith.addf %27, %28 : vector<8x1xf32>
    %30 = math.rsqrt %29 : vector<8x1xf32>
    %31 = vector.broadcast %30 : vector<8x1xf32> to vector<8x128xf32>
    %32 = arith.mulf %22, %31 : vector<8x128xf32>
    %33 = vector.broadcast %11 : vector<1x128xf32> to vector<8x128xf32>
    %34 = arith.mulf %32, %33 : vector<8x128xf32>
    %35 = vector.broadcast %12 : vector<1x128xf32> to vector<8x128xf32>
    %36 = arith.addf %34, %35 : vector<8x128xf32>
    %cst_16 = arith.constant 1.000000e+00 : f32
    %37 = vector.broadcast %cst_16 : f32 to vector<1x8xf32>
    %38 = arith.subf %37, %5 : vector<1x8xf32>
    %cst_17 = arith.constant -1.000000e+04 : f32
    %39 = vector.broadcast %cst_17 : f32 to vector<1x8xf32>
    %40 = arith.mulf %38, %39 : vector<1x8xf32>
    %c0_18 = arith.constant 0 : index
    %c0_19 = arith.constant 0 : index
    %c0_20 = arith.constant 0 : index
    %41 = vector.load %arg6[%c0_18, %c0_19, %c0_20] : memref<2x128x768xbf16, #tpu.memory_space<vmem>>, vector<1x128x768xbf16>
    %42 = vector.shape_cast %41 : vector<1x128x768xbf16> to vector<128x768xbf16>
    %43 = arith.truncf %36 : vector<8x128xf32> to vector<8x128xbf16>
    %cst_21 = arith.constant dense<0.000000e+00> : vector<8x768xf32>
    %44 = tpu.matmul %43, %42, %cst_21 {dimension_numbers = #tpu.dot_dimension_numbers<[1], [0], [0], [1], [0, 0, 1, 1], [], []>} : vector<8x128xbf16>, vector<128x768xbf16>, vector<8x768xf32> -> vector<8x768xf32>
    %c0_22 = arith.constant 0 : index
    %c0_23 = arith.constant 0 : index
    %c0_24 = arith.constant 0 : index
    %45 = vector.load %arg7[%c0_22, %c0_23, %c0_24] : memref<2x1x768xf32, #tpu.memory_space<vmem>>, vector<1x1x768xf32>
    %46 = vector.shape_cast %45 : vector<1x1x768xf32> to vector<1x768xf32>
    %47 = vector.broadcast %46 : vector<1x768xf32> to vector<8x768xf32>
    %48 = arith.addf %44, %47 : vector<8x768xf32>
    %49 = vector.extract_strided_slice %48 {offsets = [0, 0], sizes = [8, 128], strides = [1, 1]} : vector<8x768xf32> to vector<8x128xf32>
    %50 = vector.extract_strided_slice %48 {offsets = [0, 256], sizes = [8, 128], strides = [1, 1]} : vector<8x768xf32> to vector<8x128xf32>
    %51 = vector.extract_strided_slice %48 {offsets = [0, 512], sizes = [8, 128], strides = [1, 1]} : vector<8x768xf32> to vector<8x128xf32>
    %52 = arith.truncf %49 : vector<8x128xf32> to vector<8x128xbf16>
    %53 = arith.truncf %50 : vector<8x128xf32> to vector<8x128xbf16>
    "tpu.trace_start"() <{level = 10 : i32, message = "qd,kd->qk"}> : () -> ()
    %cst_25 = arith.constant dense<0.000000e+00> : vector<8x8xf32>
    %54 = tpu.matmul %52, %53, %cst_25 {dimension_numbers = #tpu.dot_dimension_numbers<[1], [1], [0], [0], [0, 0, 1, 0], [], []>} : vector<8x128xbf16>, vector<8x128xbf16>, vector<8x8xf32> -> vector<8x8xf32>
    "tpu.trace_stop"() : () -> ()
    %cst_26 = arith.constant 2.500000e-01 : f32
    %55 = vector.broadcast %cst_26 : f32 to vector<8x8xf32>
    %56 = arith.mulf %54, %55 : vector<8x8xf32>
    %57 = vector.broadcast %40 : vector<1x8xf32> to vector<8x8xf32>
    %58 = arith.addf %56, %57 : vector<8x8xf32>
    %cst_27 = arith.constant dense<0xFF800000> : vector<8xf32>
    %59 = vector.multi_reduction <maximumf>, %58, %cst_27 [1] : vector<8x8xf32> to vector<8xf32>
    %60 = vector.shape_cast %59 : vector<8xf32> to vector<8x1xf32>
    %61 = vector.broadcast %60 : vector<8x1xf32> to vector<8x8xf32>
    %62 = arith.subf %58, %61 : vector<8x8xf32>
    %63 = math.exp %62 : vector<8x8xf32>
    %cst_28 = arith.constant dense<0.000000e+00> : vector<8xf32>
    %64 = vector.multi_reduction <add>, %63, %cst_28 [1] : vector<8x8xf32> to vector<8xf32>
    %65 = vector.shape_cast %64 : vector<8xf32> to vector<8x1xf32>
    %66 = tpu.reciprocal %65 {approx = true} : vector<8x1xf32> -> vector<8x1xf32>
    %67 = vector.broadcast %66 : vector<8x1xf32> to vector<8x8xf32>
    %68 = arith.mulf %63, %67 : vector<8x8xf32>
    %69 = arith.truncf %68 : vector<8x8xf32> to vector<8x8xbf16>
    %70 = arith.truncf %51 : vector<8x128xf32> to vector<8x128xbf16>
    %cst_29 = arith.constant dense<0.000000e+00> : vector<8x128xf32>
    %71 = tpu.matmul %69, %70, %cst_29 {dimension_numbers = #tpu.dot_dimension_numbers<[1], [0], [0], [1], [0, 0, 1, 1], [], []>} : vector<8x8xbf16>, vector<8x128xbf16>, vector<8x128xf32> -> vector<8x128xf32>
    %72 = vector.extract_strided_slice %48 {offsets = [0, 128], sizes = [8, 128], strides = [1, 1]} : vector<8x768xf32> to vector<8x128xf32>
    %73 = vector.extract_strided_slice %48 {offsets = [0, 384], sizes = [8, 128], strides = [1, 1]} : vector<8x768xf32> to vector<8x128xf32>
    %74 = vector.extract_strided_slice %48 {offsets = [0, 640], sizes = [8, 128], strides = [1, 1]} : vector<8x768xf32> to vector<8x128xf32>
    %75 = arith.truncf %72 : vector<8x128xf32> to vector<8x128xbf16>
    %76 = arith.truncf %73 : vector<8x128xf32> to vector<8x128xbf16>
    "tpu.trace_start"() <{level = 10 : i32, message = "qd,kd->qk"}> : () -> ()
    %cst_30 = arith.constant dense<0.000000e+00> : vector<8x8xf32>
    %77 = tpu.matmul %75, %76, %cst_30 {dimension_numbers = #tpu.dot_dimension_numbers<[1], [1], [0], [0], [0, 0, 1, 0], [], []>} : vector<8x128xbf16>, vector<8x128xbf16>, vector<8x8xf32> -> vector<8x8xf32>
    "tpu.trace_stop"() : () -> ()
    %cst_31 = arith.constant 2.500000e-01 : f32
    %78 = vector.broadcast %cst_31 : f32 to vector<8x8xf32>
    %79 = arith.mulf %77, %78 : vector<8x8xf32>
    %80 = vector.broadcast %40 : vector<1x8xf32> to vector<8x8xf32>
    %81 = arith.addf %79, %80 : vector<8x8xf32>
    %cst_32 = arith.constant dense<0xFF800000> : vector<8xf32>
    %82 = vector.multi_reduction <maximumf>, %81, %cst_32 [1] : vector<8x8xf32> to vector<8xf32>
    %83 = vector.shape_cast %82 : vector<8xf32> to vector<8x1xf32>
    %84 = vector.broadcast %83 : vector<8x1xf32> to vector<8x8xf32>
    %85 = arith.subf %81, %84 : vector<8x8xf32>
    %86 = math.exp %85 : vector<8x8xf32>
    %cst_33 = arith.constant dense<0.000000e+00> : vector<8xf32>
    %87 = vector.multi_reduction <add>, %86, %cst_33 [1] : vector<8x8xf32> to vector<8xf32>
    %88 = vector.shape_cast %87 : vector<8xf32> to vector<8x1xf32>
    %89 = tpu.reciprocal %88 {approx = true} : vector<8x1xf32> -> vector<8x1xf32>
    %90 = vector.broadcast %89 : vector<8x1xf32> to vector<8x8xf32>
    %91 = arith.mulf %86, %90 : vector<8x8xf32>
    %92 = arith.truncf %91 : vector<8x8xf32> to vector<8x8xbf16>
    %93 = arith.truncf %74 : vector<8x128xf32> to vector<8x128xbf16>
    %cst_34 = arith.constant dense<0.000000e+00> : vector<8x128xf32>
    %94 = tpu.matmul %92, %93, %cst_34 {dimension_numbers = #tpu.dot_dimension_numbers<[1], [0], [0], [1], [0, 0, 1, 1], [], []>} : vector<8x8xbf16>, vector<8x128xbf16>, vector<8x128xf32> -> vector<8x128xf32>
    %95 = tpu.concatenate %71, %94 in 1 : vector<8x128xf32>, vector<8x128xf32> -> vector<8x256xf32>
    %c0_35 = arith.constant 0 : index
    %c0_36 = arith.constant 0 : index
    %c0_37 = arith.constant 0 : index
    %96 = vector.load %arg8[%c0_35, %c0_36, %c0_37] : memref<2x256x128xbf16, #tpu.memory_space<vmem>>, vector<1x256x128xbf16>
    %97 = vector.shape_cast %96 : vector<1x256x128xbf16> to vector<256x128xbf16>
    %98 = arith.truncf %95 : vector<8x256xf32> to vector<8x256xbf16>
    %cst_38 = arith.constant dense<0.000000e+00> : vector<8x128xf32>
    %99 = tpu.matmul %98, %97, %cst_38 {dimension_numbers = #tpu.dot_dimension_numbers<[1], [0], [0], [1], [0, 0, 1, 1], [], []>} : vector<8x256xbf16>, vector<256x128xbf16>, vector<8x128xf32> -> vector<8x128xf32>
    %c0_39 = arith.constant 0 : index
    %c0_40 = arith.constant 0 : index
    %c0_41 = arith.constant 0 : index
    %100 = vector.load %arg9[%c0_39, %c0_40, %c0_41] : memref<2x1x128xf32, #tpu.memory_space<vmem>>, vector<1x1x128xf32>
    %101 = vector.shape_cast %100 : vector<1x1x128xf32> to vector<1x128xf32>
    %102 = vector.broadcast %101 : vector<1x128xf32> to vector<8x128xf32>
    %103 = arith.addf %99, %102 : vector<8x128xf32>
    %104 = arith.addf %36, %103 : vector<8x128xf32>
    %c0_42 = arith.constant 0 : index
    %c0_43 = arith.constant 0 : index
    %c0_44 = arith.constant 0 : index
    %105 = vector.load %arg10[%c0_42, %c0_43, %c0_44] : memref<2x1x128xf32, #tpu.memory_space<vmem>>, vector<1x1x128xf32>
    %106 = vector.shape_cast %105 : vector<1x1x128xf32> to vector<1x128xf32>
    %c0_45 = arith.constant 0 : index
    %c0_46 = arith.constant 0 : index
    %c0_47 = arith.constant 0 : index
    %107 = vector.load %arg11[%c0_45, %c0_46, %c0_47] : memref<2x1x128xf32, #tpu.memory_space<vmem>>, vector<1x1x128xf32>
    %108 = vector.shape_cast %107 : vector<1x1x128xf32> to vector<1x128xf32>
    %109 = vector.broadcast %10 : vector<1x128xf32> to vector<8x128xf32>
    %110 = arith.mulf %104, %109 : vector<8x128xf32>
    %cst_48 = arith.constant dense<0.000000e+00> : vector<8xf32>
    %111 = vector.multi_reduction <add>, %110, %cst_48 [1] : vector<8x128xf32> to vector<8xf32>
    %112 = vector.shape_cast %111 : vector<8xf32> to vector<8x1xf32>
    %cst_49 = arith.constant 3.125000e-02 : f32
    %113 = vector.broadcast %cst_49 : f32 to vector<8x1xf32>
    %114 = arith.mulf %112, %113 : vector<8x1xf32>
    %115 = vector.broadcast %114 : vector<8x1xf32> to vector<8x128xf32>
    %116 = arith.subf %104, %115 : vector<8x128xf32>
    %117 = vector.broadcast %10 : vector<1x128xf32> to vector<8x128xf32>
    %118 = arith.mulf %116, %117 : vector<8x128xf32>
    %119 = arith.mulf %118, %118 : vector<8x128xf32>
    %cst_50 = arith.constant dense<0.000000e+00> : vector<8xf32>
    %120 = vector.multi_reduction <add>, %119, %cst_50 [1] : vector<8x128xf32> to vector<8xf32>
    %121 = vector.shape_cast %120 : vector<8xf32> to vector<8x1xf32>
    %cst_51 = arith.constant 3.125000e-02 : f32
    %122 = vector.broadcast %cst_51 : f32 to vector<8x1xf32>
    %123 = arith.mulf %121, %122 : vector<8x1xf32>
    %cst_52 = arith.constant 9.99999996E-13 : f32
    %124 = vector.broadcast %cst_52 : f32 to vector<8x1xf32>
    %125 = arith.addf %123, %124 : vector<8x1xf32>
    %126 = math.rsqrt %125 : vector<8x1xf32>
    %127 = vector.broadcast %126 : vector<8x1xf32> to vector<8x128xf32>
    %128 = arith.mulf %118, %127 : vector<8x128xf32>
    %129 = vector.broadcast %106 : vector<1x128xf32> to vector<8x128xf32>
    %130 = arith.mulf %128, %129 : vector<8x128xf32>
    %131 = vector.broadcast %108 : vector<1x128xf32> to vector<8x128xf32>
    %132 = arith.addf %130, %131 : vector<8x128xf32>
    %c0_53 = arith.constant 0 : index
    %c0_54 = arith.constant 0 : index
    %c0_55 = arith.constant 0 : index
    %133 = vector.load %arg12[%c0_53, %c0_54, %c0_55] : memref<2x128x128xbf16, #tpu.memory_space<vmem>>, vector<1x128x128xbf16>
    %134 = vector.shape_cast %133 : vector<1x128x128xbf16> to vector<128x128xbf16>
    %135 = arith.truncf %132 : vector<8x128xf32> to vector<8x128xbf16>
    %cst_56 = arith.constant dense<0.000000e+00> : vector<8x128xf32>
    %136 = tpu.matmul %135, %134, %cst_56 {dimension_numbers = #tpu.dot_dimension_numbers<[1], [0], [0], [1], [0, 0, 1, 1], [], []>} : vector<8x128xbf16>, vector<128x128xbf16>, vector<8x128xf32> -> vector<8x128xf32>
    %c0_57 = arith.constant 0 : index
    %c0_58 = arith.constant 0 : index
    %c0_59 = arith.constant 0 : index
    %137 = vector.load %arg13[%c0_57, %c0_58, %c0_59] : memref<2x1x128xf32, #tpu.memory_space<vmem>>, vector<1x1x128xf32>
    %138 = vector.shape_cast %137 : vector<1x1x128xf32> to vector<1x128xf32>
    %139 = vector.broadcast %138 : vector<1x128xf32> to vector<8x128xf32>
    %140 = arith.addf %136, %139 : vector<8x128xf32>
    %141 = arith.mulf %140, %140 : vector<8x128xf32>
    %142 = arith.mulf %140, %141 : vector<8x128xf32>
    %cst_60 = arith.constant 4.471500e-02 : f32
    %143 = vector.broadcast %cst_60 : f32 to vector<8x128xf32>
    %144 = arith.mulf %143, %142 : vector<8x128xf32>
    %145 = arith.addf %140, %144 : vector<8x128xf32>
    %cst_61 = arith.constant 0.797884583 : f32
    %146 = vector.broadcast %cst_61 : f32 to vector<8x128xf32>
    %147 = arith.mulf %146, %145 : vector<8x128xf32>
    %148 = math.tanh %147 : vector<8x128xf32>
    %cst_62 = arith.constant 1.000000e+00 : f32
    %149 = vector.broadcast %cst_62 : f32 to vector<8x128xf32>
    %150 = arith.addf %149, %148 : vector<8x128xf32>
    %cst_63 = arith.constant 5.000000e-01 : f32
    %151 = vector.broadcast %cst_63 : f32 to vector<8x128xf32>
    %152 = arith.mulf %151, %150 : vector<8x128xf32>
    %153 = arith.mulf %140, %152 : vector<8x128xf32>
    %c0_64 = arith.constant 0 : index
    %c0_65 = arith.constant 0 : index
    %c0_66 = arith.constant 0 : index
    %154 = vector.load %arg14[%c0_64, %c0_65, %c0_66] : memref<2x128x128xbf16, #tpu.memory_space<vmem>>, vector<1x128x128xbf16>
    %155 = vector.shape_cast %154 : vector<1x128x128xbf16> to vector<128x128xbf16>
    %156 = arith.truncf %153 : vector<8x128xf32> to vector<8x128xbf16>
    %cst_67 = arith.constant dense<0.000000e+00> : vector<8x128xf32>
    %157 = tpu.matmul %156, %155, %cst_67 {dimension_numbers = #tpu.dot_dimension_numbers<[1], [0], [0], [1], [0, 0, 1, 1], [], []>} : vector<8x128xbf16>, vector<128x128xbf16>, vector<8x128xf32> -> vector<8x128xf32>
    %c0_68 = arith.constant 0 : index
    %c0_69 = arith.constant 0 : index
    %c0_70 = arith.constant 0 : index
    %158 = vector.load %arg15[%c0_68, %c0_69, %c0_70] : memref<2x1x128xf32, #tpu.memory_space<vmem>>, vector<1x1x128xf32>
    %159 = vector.shape_cast %158 : vector<1x1x128xf32> to vector<1x128xf32>
    %160 = vector.broadcast %159 : vector<1x128xf32> to vector<8x128xf32>
    %161 = arith.addf %157, %160 : vector<8x128xf32>
    %162 = arith.addf %132, %161 : vector<8x128xf32>
    %c0_71 = arith.constant 0 : index
    %c0_72 = arith.constant 0 : index
    %c0_73 = arith.constant 0 : index
    %163 = vector.load %arg16[%c0_71, %c0_72, %c0_73] : memref<2x1x128xf32, #tpu.memory_space<vmem>>, vector<1x1x128xf32>
    %164 = vector.shape_cast %163 : vector<1x1x128xf32> to vector<1x128xf32>
    %c0_74 = arith.constant 0 : index
    %c0_75 = arith.constant 0 : index
    %c0_76 = arith.constant 0 : index
    %165 = vector.load %arg17[%c0_74, %c0_75, %c0_76] : memref<2x1x128xf32, #tpu.memory_space<vmem>>, vector<1x1x128xf32>
    %166 = vector.shape_cast %165 : vector<1x1x128xf32> to vector<1x128xf32>
    %167 = vector.broadcast %10 : vector<1x128xf32> to vector<8x128xf32>
    %168 = arith.mulf %162, %167 : vector<8x128xf32>
    %cst_77 = arith.constant dense<0.000000e+00> : vector<8xf32>
    %169 = vector.multi_reduction <add>, %168, %cst_77 [1] : vector<8x128xf32> to vector<8xf32>
    %170 = vector.shape_cast %169 : vector<8xf32> to vector<8x1xf32>
    %cst_78 = arith.constant 3.125000e-02 : f32
    %171 = vector.broadcast %cst_78 : f32 to vector<8x1xf32>
    %172 = arith.mulf %170, %171 : vector<8x1xf32>
    %173 = vector.broadcast %172 : vector<8x1xf32> to vector<8x128xf32>
    %174 = arith.subf %162, %173 : vector<8x128xf32>
    %175 = vector.broadcast %10 : vector<1x128xf32> to vector<8x128xf32>
    %176 = arith.mulf %174, %175 : vector<8x128xf32>
    %177 = arith.mulf %176, %176 : vector<8x128xf32>
    %cst_79 = arith.constant dense<0.000000e+00> : vector<8xf32>
    %178 = vector.multi_reduction <add>, %177, %cst_79 [1] : vector<8x128xf32> to vector<8xf32>
    %179 = vector.shape_cast %178 : vector<8xf32> to vector<8x1xf32>
    %cst_80 = arith.constant 3.125000e-02 : f32
    %180 = vector.broadcast %cst_80 : f32 to vector<8x1xf32>
    %181 = arith.mulf %179, %180 : vector<8x1xf32>
    %cst_81 = arith.constant 9.99999996E-13 : f32
    %182 = vector.broadcast %cst_81 : f32 to vector<8x1xf32>
    %183 = arith.addf %181, %182 : vector<8x1xf32>
    %184 = math.rsqrt %183 : vector<8x1xf32>
    %185 = vector.broadcast %184 : vector<8x1xf32> to vector<8x128xf32>
    %186 = arith.mulf %176, %185 : vector<8x128xf32>
    %187 = vector.broadcast %164 : vector<1x128xf32> to vector<8x128xf32>
    %188 = arith.mulf %186, %187 : vector<8x128xf32>
    %189 = vector.broadcast %166 : vector<1x128xf32> to vector<8x128xf32>
    %190 = arith.addf %188, %189 : vector<8x128xf32>
    %c1 = arith.constant 1 : index
    %c0_82 = arith.constant 0 : index
    %c0_83 = arith.constant 0 : index
    %191 = vector.load %arg6[%c1, %c0_82, %c0_83] : memref<2x128x768xbf16, #tpu.memory_space<vmem>>, vector<1x128x768xbf16>
    %192 = vector.shape_cast %191 : vector<1x128x768xbf16> to vector<128x768xbf16>
    %193 = arith.truncf %190 : vector<8x128xf32> to vector<8x128xbf16>
    %cst_84 = arith.constant dense<0.000000e+00> : vector<8x768xf32>
    %194 = tpu.matmul %193, %192, %cst_84 {dimension_numbers = #tpu.dot_dimension_numbers<[1], [0], [0], [1], [0, 0, 1, 1], [], []>} : vector<8x128xbf16>, vector<128x768xbf16>, vector<8x768xf32> -> vector<8x768xf32>
    %c1_85 = arith.constant 1 : index
    %c0_86 = arith.constant 0 : index
    %c0_87 = arith.constant 0 : index
    %195 = vector.load %arg7[%c1_85, %c0_86, %c0_87] : memref<2x1x768xf32, #tpu.memory_space<vmem>>, vector<1x1x768xf32>
    %196 = vector.shape_cast %195 : vector<1x1x768xf32> to vector<1x768xf32>
    %197 = vector.broadcast %196 : vector<1x768xf32> to vector<8x768xf32>
    %198 = arith.addf %194, %197 : vector<8x768xf32>
    %199 = vector.extract_strided_slice %198 {offsets = [0, 0], sizes = [8, 128], strides = [1, 1]} : vector<8x768xf32> to vector<8x128xf32>
    %200 = vector.extract_strided_slice %198 {offsets = [0, 256], sizes = [8, 128], strides = [1, 1]} : vector<8x768xf32> to vector<8x128xf32>
    %201 = vector.extract_strided_slice %198 {offsets = [0, 512], sizes = [8, 128], strides = [1, 1]} : vector<8x768xf32> to vector<8x128xf32>
    %202 = arith.truncf %199 : vector<8x128xf32> to vector<8x128xbf16>
    %203 = arith.truncf %200 : vector<8x128xf32> to vector<8x128xbf16>
    "tpu.trace_start"() <{level = 10 : i32, message = "qd,kd->qk"}> : () -> ()
    %cst_88 = arith.constant dense<0.000000e+00> : vector<8x8xf32>
    %204 = tpu.matmul %202, %203, %cst_88 {dimension_numbers = #tpu.dot_dimension_numbers<[1], [1], [0], [0], [0, 0, 1, 0], [], []>} : vector<8x128xbf16>, vector<8x128xbf16>, vector<8x8xf32> -> vector<8x8xf32>
    "tpu.trace_stop"() : () -> ()
    %cst_89 = arith.constant 2.500000e-01 : f32
    %205 = vector.broadcast %cst_89 : f32 to vector<8x8xf32>
    %206 = arith.mulf %204, %205 : vector<8x8xf32>
    %207 = vector.broadcast %40 : vector<1x8xf32> to vector<8x8xf32>
    %208 = arith.addf %206, %207 : vector<8x8xf32>
    %cst_90 = arith.constant dense<0xFF800000> : vector<8xf32>
    %209 = vector.multi_reduction <maximumf>, %208, %cst_90 [1] : vector<8x8xf32> to vector<8xf32>
    %210 = vector.shape_cast %209 : vector<8xf32> to vector<8x1xf32>
    %211 = vector.broadcast %210 : vector<8x1xf32> to vector<8x8xf32>
    %212 = arith.subf %208, %211 : vector<8x8xf32>
    %213 = math.exp %212 : vector<8x8xf32>
    %cst_91 = arith.constant dense<0.000000e+00> : vector<8xf32>
    %214 = vector.multi_reduction <add>, %213, %cst_91 [1] : vector<8x8xf32> to vector<8xf32>
    %215 = vector.shape_cast %214 : vector<8xf32> to vector<8x1xf32>
    %216 = tpu.reciprocal %215 {approx = true} : vector<8x1xf32> -> vector<8x1xf32>
    %217 = vector.broadcast %216 : vector<8x1xf32> to vector<8x8xf32>
    %218 = arith.mulf %213, %217 : vector<8x8xf32>
    %219 = arith.truncf %218 : vector<8x8xf32> to vector<8x8xbf16>
    %220 = arith.truncf %201 : vector<8x128xf32> to vector<8x128xbf16>
    %cst_92 = arith.constant dense<0.000000e+00> : vector<8x128xf32>
    %221 = tpu.matmul %219, %220, %cst_92 {dimension_numbers = #tpu.dot_dimension_numbers<[1], [0], [0], [1], [0, 0, 1, 1], [], []>} : vector<8x8xbf16>, vector<8x128xbf16>, vector<8x128xf32> -> vector<8x128xf32>
    %222 = vector.extract_strided_slice %198 {offsets = [0, 128], sizes = [8, 128], strides = [1, 1]} : vector<8x768xf32> to vector<8x128xf32>
    %223 = vector.extract_strided_slice %198 {offsets = [0, 384], sizes = [8, 128], strides = [1, 1]} : vector<8x768xf32> to vector<8x128xf32>
    %224 = vector.extract_strided_slice %198 {offsets = [0, 640], sizes = [8, 128], strides = [1, 1]} : vector<8x768xf32> to vector<8x128xf32>
    %225 = arith.truncf %222 : vector<8x128xf32> to vector<8x128xbf16>
    %226 = arith.truncf %223 : vector<8x128xf32> to vector<8x128xbf16>
    "tpu.trace_start"() <{level = 10 : i32, message = "qd,kd->qk"}> : () -> ()
    %cst_93 = arith.constant dense<0.000000e+00> : vector<8x8xf32>
    %227 = tpu.matmul %225, %226, %cst_93 {dimension_numbers = #tpu.dot_dimension_numbers<[1], [1], [0], [0], [0, 0, 1, 0], [], []>} : vector<8x128xbf16>, vector<8x128xbf16>, vector<8x8xf32> -> vector<8x8xf32>
    "tpu.trace_stop"() : () -> ()
    %cst_94 = arith.constant 2.500000e-01 : f32
    %228 = vector.broadcast %cst_94 : f32 to vector<8x8xf32>
    %229 = arith.mulf %227, %228 : vector<8x8xf32>
    %230 = vector.broadcast %40 : vector<1x8xf32> to vector<8x8xf32>
    %231 = arith.addf %229, %230 : vector<8x8xf32>
    %cst_95 = arith.constant dense<0xFF800000> : vector<8xf32>
    %232 = vector.multi_reduction <maximumf>, %231, %cst_95 [1] : vector<8x8xf32> to vector<8xf32>
    %233 = vector.shape_cast %232 : vector<8xf32> to vector<8x1xf32>
    %234 = vector.broadcast %233 : vector<8x1xf32> to vector<8x8xf32>
    %235 = arith.subf %231, %234 : vector<8x8xf32>
    %236 = math.exp %235 : vector<8x8xf32>
    %cst_96 = arith.constant dense<0.000000e+00> : vector<8xf32>
    %237 = vector.multi_reduction <add>, %236, %cst_96 [1] : vector<8x8xf32> to vector<8xf32>
    %238 = vector.shape_cast %237 : vector<8xf32> to vector<8x1xf32>
    %239 = tpu.reciprocal %238 {approx = true} : vector<8x1xf32> -> vector<8x1xf32>
    %240 = vector.broadcast %239 : vector<8x1xf32> to vector<8x8xf32>
    %241 = arith.mulf %236, %240 : vector<8x8xf32>
    %242 = arith.truncf %241 : vector<8x8xf32> to vector<8x8xbf16>
    %243 = arith.truncf %224 : vector<8x128xf32> to vector<8x128xbf16>
    %cst_97 = arith.constant dense<0.000000e+00> : vector<8x128xf32>
    %244 = tpu.matmul %242, %243, %cst_97 {dimension_numbers = #tpu.dot_dimension_numbers<[1], [0], [0], [1], [0, 0, 1, 1], [], []>} : vector<8x8xbf16>, vector<8x128xbf16>, vector<8x128xf32> -> vector<8x128xf32>
    %245 = tpu.concatenate %221, %244 in 1 : vector<8x128xf32>, vector<8x128xf32> -> vector<8x256xf32>
    %c1_98 = arith.constant 1 : index
    %c0_99 = arith.constant 0 : index
    %c0_100 = arith.constant 0 : index
    %246 = vector.load %arg8[%c1_98, %c0_99, %c0_100] : memref<2x256x128xbf16, #tpu.memory_space<vmem>>, vector<1x256x128xbf16>
    %247 = vector.shape_cast %246 : vector<1x256x128xbf16> to vector<256x128xbf16>
    %248 = arith.truncf %245 : vector<8x256xf32> to vector<8x256xbf16>
    %cst_101 = arith.constant dense<0.000000e+00> : vector<8x128xf32>
    %249 = tpu.matmul %248, %247, %cst_101 {dimension_numbers = #tpu.dot_dimension_numbers<[1], [0], [0], [1], [0, 0, 1, 1], [], []>} : vector<8x256xbf16>, vector<256x128xbf16>, vector<8x128xf32> -> vector<8x128xf32>
    %c1_102 = arith.constant 1 : index
    %c0_103 = arith.constant 0 : index
    %c0_104 = arith.constant 0 : index
    %250 = vector.load %arg9[%c1_102, %c0_103, %c0_104] : memref<2x1x128xf32, #tpu.memory_space<vmem>>, vector<1x1x128xf32>
    %251 = vector.shape_cast %250 : vector<1x1x128xf32> to vector<1x128xf32>
    %252 = vector.broadcast %251 : vector<1x128xf32> to vector<8x128xf32>
    %253 = arith.addf %249, %252 : vector<8x128xf32>
    %254 = arith.addf %190, %253 : vector<8x128xf32>
    %c1_105 = arith.constant 1 : index
    %c0_106 = arith.constant 0 : index
    %c0_107 = arith.constant 0 : index
    %255 = vector.load %arg10[%c1_105, %c0_106, %c0_107] : memref<2x1x128xf32, #tpu.memory_space<vmem>>, vector<1x1x128xf32>
    %256 = vector.shape_cast %255 : vector<1x1x128xf32> to vector<1x128xf32>
    %c1_108 = arith.constant 1 : index
    %c0_109 = arith.constant 0 : index
    %c0_110 = arith.constant 0 : index
    %257 = vector.load %arg11[%c1_108, %c0_109, %c0_110] : memref<2x1x128xf32, #tpu.memory_space<vmem>>, vector<1x1x128xf32>
    %258 = vector.shape_cast %257 : vector<1x1x128xf32> to vector<1x128xf32>
    %259 = vector.broadcast %10 : vector<1x128xf32> to vector<8x128xf32>
    %260 = arith.mulf %254, %259 : vector<8x128xf32>
    %cst_111 = arith.constant dense<0.000000e+00> : vector<8xf32>
    %261 = vector.multi_reduction <add>, %260, %cst_111 [1] : vector<8x128xf32> to vector<8xf32>
    %262 = vector.shape_cast %261 : vector<8xf32> to vector<8x1xf32>
    %cst_112 = arith.constant 3.125000e-02 : f32
    %263 = vector.broadcast %cst_112 : f32 to vector<8x1xf32>
    %264 = arith.mulf %262, %263 : vector<8x1xf32>
    %265 = vector.broadcast %264 : vector<8x1xf32> to vector<8x128xf32>
    %266 = arith.subf %254, %265 : vector<8x128xf32>
    %267 = vector.broadcast %10 : vector<1x128xf32> to vector<8x128xf32>
    %268 = arith.mulf %266, %267 : vector<8x128xf32>
    %269 = arith.mulf %268, %268 : vector<8x128xf32>
    %cst_113 = arith.constant dense<0.000000e+00> : vector<8xf32>
    %270 = vector.multi_reduction <add>, %269, %cst_113 [1] : vector<8x128xf32> to vector<8xf32>
    %271 = vector.shape_cast %270 : vector<8xf32> to vector<8x1xf32>
    %cst_114 = arith.constant 3.125000e-02 : f32
    %272 = vector.broadcast %cst_114 : f32 to vector<8x1xf32>
    %273 = arith.mulf %271, %272 : vector<8x1xf32>
    %cst_115 = arith.constant 9.99999996E-13 : f32
    %274 = vector.broadcast %cst_115 : f32 to vector<8x1xf32>
    %275 = arith.addf %273, %274 : vector<8x1xf32>
    %276 = math.rsqrt %275 : vector<8x1xf32>
    %277 = vector.broadcast %276 : vector<8x1xf32> to vector<8x128xf32>
    %278 = arith.mulf %268, %277 : vector<8x128xf32>
    %279 = vector.broadcast %256 : vector<1x128xf32> to vector<8x128xf32>
    %280 = arith.mulf %278, %279 : vector<8x128xf32>
    %281 = vector.broadcast %258 : vector<1x128xf32> to vector<8x128xf32>
    %282 = arith.addf %280, %281 : vector<8x128xf32>
    %c1_116 = arith.constant 1 : index
    %c0_117 = arith.constant 0 : index
    %c0_118 = arith.constant 0 : index
    %283 = vector.load %arg12[%c1_116, %c0_117, %c0_118] : memref<2x128x128xbf16, #tpu.memory_space<vmem>>, vector<1x128x128xbf16>
    %284 = vector.shape_cast %283 : vector<1x128x128xbf16> to vector<128x128xbf16>
    %285 = arith.truncf %282 : vector<8x128xf32> to vector<8x128xbf16>
    %cst_119 = arith.constant dense<0.000000e+00> : vector<8x128xf32>
    %286 = tpu.matmul %285, %284, %cst_119 {dimension_numbers = #tpu.dot_dimension_numbers<[1], [0], [0], [1], [0, 0, 1, 1], [], []>} : vector<8x128xbf16>, vector<128x128xbf16>, vector<8x128xf32> -> vector<8x128xf32>
    %c1_120 = arith.constant 1 : index
    %c0_121 = arith.constant 0 : index
    %c0_122 = arith.constant 0 : index
    %287 = vector.load %arg13[%c1_120, %c0_121, %c0_122] : memref<2x1x128xf32, #tpu.memory_space<vmem>>, vector<1x1x128xf32>
    %288 = vector.shape_cast %287 : vector<1x1x128xf32> to vector<1x128xf32>
    %289 = vector.broadcast %288 : vector<1x128xf32> to vector<8x128xf32>
    %290 = arith.addf %286, %289 : vector<8x128xf32>
    %291 = arith.mulf %290, %290 : vector<8x128xf32>
    %292 = arith.mulf %290, %291 : vector<8x128xf32>
    %cst_123 = arith.constant 4.471500e-02 : f32
    %293 = vector.broadcast %cst_123 : f32 to vector<8x128xf32>
    %294 = arith.mulf %293, %292 : vector<8x128xf32>
    %295 = arith.addf %290, %294 : vector<8x128xf32>
    %cst_124 = arith.constant 0.797884583 : f32
    %296 = vector.broadcast %cst_124 : f32 to vector<8x128xf32>
    %297 = arith.mulf %296, %295 : vector<8x128xf32>
    %298 = math.tanh %297 : vector<8x128xf32>
    %cst_125 = arith.constant 1.000000e+00 : f32
    %299 = vector.broadcast %cst_125 : f32 to vector<8x128xf32>
    %300 = arith.addf %299, %298 : vector<8x128xf32>
    %cst_126 = arith.constant 5.000000e-01 : f32
    %301 = vector.broadcast %cst_126 : f32 to vector<8x128xf32>
    %302 = arith.mulf %301, %300 : vector<8x128xf32>
    %303 = arith.mulf %290, %302 : vector<8x128xf32>
    %c1_127 = arith.constant 1 : index
    %c0_128 = arith.constant 0 : index
    %c0_129 = arith.constant 0 : index
    %304 = vector.load %arg14[%c1_127, %c0_128, %c0_129] : memref<2x128x128xbf16, #tpu.memory_space<vmem>>, vector<1x128x128xbf16>
    %305 = vector.shape_cast %304 : vector<1x128x128xbf16> to vector<128x128xbf16>
    %306 = arith.truncf %303 : vector<8x128xf32> to vector<8x128xbf16>
    %cst_130 = arith.constant dense<0.000000e+00> : vector<8x128xf32>
    %307 = tpu.matmul %306, %305, %cst_130 {dimension_numbers = #tpu.dot_dimension_numbers<[1], [0], [0], [1], [0, 0, 1, 1], [], []>} : vector<8x128xbf16>, vector<128x128xbf16>, vector<8x128xf32> -> vector<8x128xf32>
    %c1_131 = arith.constant 1 : index
    %c0_132 = arith.constant 0 : index
    %c0_133 = arith.constant 0 : index
    %308 = vector.load %arg15[%c1_131, %c0_132, %c0_133] : memref<2x1x128xf32, #tpu.memory_space<vmem>>, vector<1x1x128xf32>
    %309 = vector.shape_cast %308 : vector<1x1x128xf32> to vector<1x128xf32>
    %310 = vector.broadcast %309 : vector<1x128xf32> to vector<8x128xf32>
    %311 = arith.addf %307, %310 : vector<8x128xf32>
    %312 = arith.addf %282, %311 : vector<8x128xf32>
    %c1_134 = arith.constant 1 : index
    %c0_135 = arith.constant 0 : index
    %c0_136 = arith.constant 0 : index
    %313 = vector.load %arg16[%c1_134, %c0_135, %c0_136] : memref<2x1x128xf32, #tpu.memory_space<vmem>>, vector<1x1x128xf32>
    %314 = vector.shape_cast %313 : vector<1x1x128xf32> to vector<1x128xf32>
    %c1_137 = arith.constant 1 : index
    %c0_138 = arith.constant 0 : index
    %c0_139 = arith.constant 0 : index
    %315 = vector.load %arg17[%c1_137, %c0_138, %c0_139] : memref<2x1x128xf32, #tpu.memory_space<vmem>>, vector<1x1x128xf32>
    %316 = vector.shape_cast %315 : vector<1x1x128xf32> to vector<1x128xf32>
    %317 = vector.broadcast %10 : vector<1x128xf32> to vector<8x128xf32>
    %318 = arith.mulf %312, %317 : vector<8x128xf32>
    %cst_140 = arith.constant dense<0.000000e+00> : vector<8xf32>
    %319 = vector.multi_reduction <add>, %318, %cst_140 [1] : vector<8x128xf32> to vector<8xf32>
    %320 = vector.shape_cast %319 : vector<8xf32> to vector<8x1xf32>
    %cst_141 = arith.constant 3.125000e-02 : f32
    %321 = vector.broadcast %cst_141 : f32 to vector<8x1xf32>
    %322 = arith.mulf %320, %321 : vector<8x1xf32>
    %323 = vector.broadcast %322 : vector<8x1xf32> to vector<8x128xf32>
    %324 = arith.subf %312, %323 : vector<8x128xf32>
    %325 = vector.broadcast %10 : vector<1x128xf32> to vector<8x128xf32>
    %326 = arith.mulf %324, %325 : vector<8x128xf32>
    %327 = arith.mulf %326, %326 : vector<8x128xf32>
    %cst_142 = arith.constant dense<0.000000e+00> : vector<8xf32>
    %328 = vector.multi_reduction <add>, %327, %cst_142 [1] : vector<8x128xf32> to vector<8xf32>
    %329 = vector.shape_cast %328 : vector<8xf32> to vector<8x1xf32>
    %cst_143 = arith.constant 3.125000e-02 : f32
    %330 = vector.broadcast %cst_143 : f32 to vector<8x1xf32>
    %331 = arith.mulf %329, %330 : vector<8x1xf32>
    %cst_144 = arith.constant 9.99999996E-13 : f32
    %332 = vector.broadcast %cst_144 : f32 to vector<8x1xf32>
    %333 = arith.addf %331, %332 : vector<8x1xf32>
    %334 = math.rsqrt %333 : vector<8x1xf32>
    %335 = vector.broadcast %334 : vector<8x1xf32> to vector<8x128xf32>
    %336 = arith.mulf %326, %335 : vector<8x128xf32>
    %337 = vector.broadcast %314 : vector<1x128xf32> to vector<8x128xf32>
    %338 = arith.mulf %336, %337 : vector<8x128xf32>
    %339 = vector.broadcast %316 : vector<1x128xf32> to vector<8x128xf32>
    %340 = arith.addf %338, %339 : vector<8x128xf32>
    %341 = vector.broadcast %3 : vector<8x1xf32> to vector<8x128xf32>
    %342 = arith.mulf %340, %341 : vector<8x128xf32>
    %cst_145 = arith.constant dense<0.000000e+00> : vector<128xf32>
    %343 = vector.multi_reduction <add>, %342, %cst_145 [0] : vector<8x128xf32> to vector<128xf32>
    %344 = vector.shape_cast %343 : vector<128xf32> to vector<1x128xf32>
    %cst_146 = arith.constant dense<0.000000e+00> : vector<1xf32>
    %345 = vector.multi_reduction <add>, %3, %cst_146 [0] : vector<8x1xf32> to vector<1xf32>
    %346 = vector.shape_cast %345 : vector<1xf32> to vector<1x1xf32>
    %cst_147 = arith.constant 9.99999974E-5 : f32
    %347 = vector.broadcast %cst_147 : f32 to vector<1x1xf32>
    %348 = arith.maximumf %346, %347 : vector<1x1xf32>
    %349 = tpu.reciprocal %348 {approx = true} : vector<1x1xf32> -> vector<1x1xf32>
    %350 = vector.broadcast %349 : vector<1x1xf32> to vector<1x128xf32>
    %351 = arith.mulf %344, %350 : vector<1x128xf32>
    %352 = arith.mulf %351, %351 : vector<1x128xf32>
    %353 = arith.mulf %352, %10 : vector<1x128xf32>
    %cst_148 = arith.constant dense<0.000000e+00> : vector<1xf32>
    %354 = vector.multi_reduction <add>, %353, %cst_148 [1] : vector<1x128xf32> to vector<1xf32>
    %355 = vector.shape_cast %354 : vector<1xf32> to vector<1x1xf32>
    %356 = arith.mulf %351, %10 : vector<1x128xf32>
    %cst_149 = arith.constant 1.000000e-24 : f32
    %357 = vector.broadcast %cst_149 : f32 to vector<1x1xf32>
    %358 = arith.maximumf %355, %357 : vector<1x1xf32>
    %359 = math.rsqrt %358 : vector<1x1xf32>
    %360 = vector.broadcast %359 : vector<1x1xf32> to vector<1x128xf32>
    %361 = arith.mulf %356, %360 : vector<1x128xf32>
    %362 = vector.shape_cast %361 : vector<1x128xf32> to vector<1x1x128xf32>
    %c0_150 = arith.constant 0 : index
    %c0_151 = arith.constant 0 : index
    %c0_152 = arith.constant 0 : index
    %363 = vector.load %arg18[%c0_150, %c0_151, %c0_152] : memref<1x1x128xf32, #tpu.memory_space<vmem>>, vector<1x1x128xf32>
    tpu.vector_store %arg18[%c0_150, %c0_151, %c0_152], %362 {strides = array<i32>} : memref<1x1x128xf32, #tpu.memory_space<vmem>>, vector<1x1x128xf32>,
    return
  }
  func.func @transform_0(%arg0: i32) -> (i32, i32, i32) {
    %c0_i32 = arith.constant 0 : i32
    %c0_i32_0 = arith.constant 0 : i32
    %c0_i32_1 = arith.constant 0 : i32
    return %arg0, %c0_i32, %c0_i32_0 : i32, i32, i32
  }
  func.func @transform_1(%arg0: i32) -> (i32, i32, i32) {
    %c0_i32 = arith.constant 0 : i32
    %c0_i32_0 = arith.constant 0 : i32
    %c0_i32_1 = arith.constant 0 : i32
    return %arg0, %c0_i32, %c0_i32_0 : i32, i32, i32
  }
  func.func @transform_2(%arg0: i32) -> (i32, i32, i32) {
    %c0_i32 = arith.constant 0 : i32
    %c0_i32_0 = arith.constant 0 : i32
    %c0_i32_1 = arith.constant 0 : i32
    return %arg0, %c0_i32, %c0_i32_0 : i32, i32, i32
  }
  func.func @transform_3(%arg0: i32) -> (i32, i32) {
    %c0_i32 = arith.constant 0 : i32
    %c0_i32_0 = arith.constant 0 : i32
    %c0_i32_1 = arith.constant 0 : i32
    return %c0_i32, %c0_i32_0 : i32, i32
  }
  func.func @transform_4(%arg0: i32) -> (i32, i32) {
    %c0_i32 = arith.constant 0 : i32
    %c0_i32_0 = arith.constant 0 : i32
    %c0_i32_1 = arith.constant 0 : i32
    return %c0_i32, %c0_i32_0 : i32, i32
  }
  func.func @transform_5(%arg0: i32) -> (i32, i32, i32) {
    %c0_i32 = arith.constant 0 : i32
    %c0_i32_0 = arith.constant 0 : i32
    %c0_i32_1 = arith.constant 0 : i32
    %c0_i32_2 = arith.constant 0 : i32
    return %c0_i32, %c0_i32_0, %c0_i32_1 : i32, i32, i32
  }
  func.func @transform_6(%arg0: i32) -> (i32, i32, i32) {
    %c0_i32 = arith.constant 0 : i32
    %c0_i32_0 = arith.constant 0 : i32
    %c0_i32_1 = arith.constant 0 : i32
    %c0_i32_2 = arith.constant 0 : i32
    return %c0_i32, %c0_i32_0, %c0_i32_1 : i32, i32, i32
  }
  func.func @transform_7(%arg0: i32) -> (i32, i32, i32) {
    %c0_i32 = arith.constant 0 : i32
    %c0_i32_0 = arith.constant 0 : i32
    %c0_i32_1 = arith.constant 0 : i32
    %c0_i32_2 = arith.constant 0 : i32
    return %c0_i32, %c0_i32_0, %c0_i32_1 : i32, i32, i32
  }
  func.func @transform_8(%arg0: i32) -> (i32, i32, i32) {
    %c0_i32 = arith.constant 0 : i32
    %c0_i32_0 = arith.constant 0 : i32
    %c0_i32_1 = arith.constant 0 : i32
    %c0_i32_2 = arith.constant 0 : i32
    return %c0_i32, %c0_i32_0, %c0_i32_1 : i32, i32, i32
  }
  func.func @transform_9(%arg0: i32) -> (i32, i32, i32) {
    %c0_i32 = arith.constant 0 : i32
    %c0_i32_0 = arith.constant 0 : i32
    %c0_i32_1 = arith.constant 0 : i32
    %c0_i32_2 = arith.constant 0 : i32
    return %c0_i32, %c0_i32_0, %c0_i32_1 : i32, i32, i32
  }
  func.func @transform_10(%arg0: i32) -> (i32, i32, i32) {
    %c0_i32 = arith.constant 0 : i32
    %c0_i32_0 = arith.constant 0 : i32
    %c0_i32_1 = arith.constant 0 : i32
    %c0_i32_2 = arith.constant 0 : i32
    return %c0_i32, %c0_i32_0, %c0_i32_1 : i32, i32, i32
  }
  func.func @transform_11(%arg0: i32) -> (i32, i32, i32) {
    %c0_i32 = arith.constant 0 : i32
    %c0_i32_0 = arith.constant 0 : i32
    %c0_i32_1 = arith.constant 0 : i32
    %c0_i32_2 = arith.constant 0 : i32
    return %c0_i32, %c0_i32_0, %c0_i32_1 : i32, i32, i32
  }
  func.func @transform_12(%arg0: i32) -> (i32, i32, i32) {
    %c0_i32 = arith.constant 0 : i32
    %c0_i32_0 = arith.constant 0 : i32
    %c0_i32_1 = arith.constant 0 : i32
    %c0_i32_2 = arith.constant 0 : i32
    return %c0_i32, %c0_i32_0, %c0_i32_1 : i32, i32, i32
  }
  func.func @transform_13(%arg0: i32) -> (i32, i32, i32) {
    %c0_i32 = arith.constant 0 : i32
    %c0_i32_0 = arith.constant 0 : i32
    %c0_i32_1 = arith.constant 0 : i32
    %c0_i32_2 = arith.constant 0 : i32
    return %c0_i32, %c0_i32_0, %c0_i32_1 : i32, i32, i32
  }
  func.func @transform_14(%arg0: i32) -> (i32, i32, i32) {
    %c0_i32 = arith.constant 0 : i32
    %c0_i32_0 = arith.constant 0 : i32
    %c0_i32_1 = arith.constant 0 : i32
    %c0_i32_2 = arith.constant 0 : i32
    return %c0_i32, %c0_i32_0, %c0_i32_1 : i32, i32, i32
  }
  func.func @transform_15(%arg0: i32) -> (i32, i32, i32) {
    %c0_i32 = arith.constant 0 : i32
    %c0_i32_0 = arith.constant 0 : i32
    %c0_i32_1 = arith.constant 0 : i32
    %c0_i32_2 = arith.constant 0 : i32
    return %c0_i32, %c0_i32_0, %c0_i32_1 : i32, i32, i32
  }
  func.func @transform_16(%arg0: i32) -> (i32, i32, i32) {
    %c0_i32 = arith.constant 0 : i32
    %c0_i32_0 = arith.constant 0 : i32
    %c0_i32_1 = arith.constant 0 : i32
    %c0_i32_2 = arith.constant 0 : i32
    return %c0_i32, %c0_i32_0, %c0_i32_1 : i32, i32, i32
  }
  func.func @transform_17(%arg0: i32) -> (i32, i32, i32) {
    %c0_i32 = arith.constant 0 : i32
    %c0_i32_0 = arith.constant 0 : i32
    %c0_i32_1 = arith.constant 0 : i32
    return %arg0, %c0_i32, %c0_i32_0 : i32, i32, i32
  }
}

</mosaic_0001>

<bundles_post_ra>
// kernel: tpu_custom_call.1
= control target key start
LH: loop header
LB: loop body
LE: loop exit
PB: predicated region body
PF: predicated region fallthrough
CT: control target
= control target key end

     0   :  { %s4377_s0 = inlined_call_operand.vmem [shape: f32[4,8,128], index: 0, kind: input, shape index: {}]   ;;  %s4378_s1 = inlined_call_operand.vmem [shape: f32[4,8,1], index: 1, kind: input, shape index: {}]   ;;  %s4379_s2 = inlined_call_operand.vmem [shape: f32[4,1,8], index: 2, kind: input, shape index: {}]   ;;  %s4380_s3 = inlined_call_operand.hbm [shape: f32[1,128], index: 3, kind: input, shape index: {}]   ;;  %s4381_s4 = inlined_call_operand.hbm [shape: f32[1,128], index: 4, kind: input, shape index: {}]   ;;  %s4382_s5 = inlined_call_operand.hbm [shape: bf16[2,128,768], index: 5, kind: input, shape index: {}]   ;;  %s4383_s6 = inlined_call_operand.hbm [shape: f32[2,1,768], index: 6, kind: input, shape index: {}]   ;;  %s4384_s7 = inlined_call_operand.hbm [shape: bf16[2,256,128], index: 7, kind: input, shape index: {}]   ;;  %s4385_s8 = inlined_call_operand.vmem [shape: f32[2,1,128], index: 8, kind: input, shape index: {}]   ;;  %s4386_s9 = inlined_call_operand.vmem [shape: f32[2,1,128], index: 9, kind: input, shape index: {}]   ;;  %s4387_s10 = inlined_call_operand.vmem [shape: f32[2,1,128], index: 10, kind: input, shape index: {}]   ;;  %s4388_s11 = inlined_call_operand.hbm [shape: bf16[2,128,128], index: 11, kind: input, shape index: {}]   ;;  %s4389_s12 = inlined_call_operand.vmem [shape: f32[2,1,128], index: 12, kind: input, shape index: {}]   ;;  %s4390_s13 = inlined_call_operand.hbm [shape: bf16[2,128,128], index: 13, kind: input, shape index: {}]   ;;  %s4391_s14 = inlined_call_operand.vmem [shape: f32[2,1,128], index: 14, kind: input, shape index: {}]   ;;  %s4392_s15 = inlined_call_operand.vmem [shape: f32[2,1,128], index: 15, kind: input, shape index: {}]   ;;  %s4393_s16 = inlined_call_operand.vmem [shape: f32[2,1,128], index: 16, kind: input, shape index: {}]   ;;  %s4394_s17 = inlined_call_operand.hbm [shape: f32[4,1,128], index: 17, kind: output, shape index: {}]  }
   0x1   :  { %4409 = sst [smem:[#allocation28_spill]] %s4377_s0 }
   0x2   :  { %4410 = sst [smem:[#allocation29_spill]] %s4378_s1 }
   0x3   :  { %4411 = sst [smem:[#allocation30_spill]] %s4381_s4 }
   0x4   :  { %4412 = sst [smem:[#allocation31_spill]] %s4383_s6 }
   0x5   :  { %4413 = sst [smem:[#allocation32_spill]] %s4394_s17 }
   0x6   :  { %22 = vsyncpa [#allocation3], 0 }
   0x7   :  { %23 = vsyncpa [#allocation6], 0 }
   0x8   :  { %24 = vsyncpa [#allocation9], 0 }
   0x9   :  { %25 = vsyncpa [#allocation12], 0 }
   0xa   :  { %26 = vsyncpa [#allocation4], 0 }
   0xb   :  { %28 = vsyncpa [#allocation4 + $0x1], 0  ;;  %s4105_s24 = smov 0   ;;  %s4107_s25 = smov 0  }
   0xc   :  { %s4109_s26 = smov 0   ;;  %s4111_s27 = smov 0  }
   0xd LB: > { %4414 = sst [smem:[#allocation20_spill]] %s3986_s24  ;;  %s4126_s28 = sadd.s32 4294967295, %s3998_s27   ;;  %s3998_s27 = sphi %s4111_s27, %s4438_s27   ;;  %s3994_s26 = sphi %s4109_s26, %s4441_s26   ;;  %s3990_s25 = sphi %s4107_s25, %s4440_s25   ;;  %s3986_s24 = sphi %s4105_s24, %s4439_s24  }
   0xe   : > { %4415 = sst [smem:[#allocation21_spill]] %s3990_s25  ;;  %s2706_s29 = sadd.s32 4294967294, %s3998_s27  }
   0xf   : > { %4416 = sst [smem:[#allocation22_spill]] %s3994_s26  ;;  %s4130_s0 = sadd.s32 1, %s3998_s27  }
  0x10   : > { %4417 = sst [smem:[#allocation23_spill]] %s3998_s27  ;;  %s413_s30 = sadd.s32 1, %s3994_s26 }
  0x11   : > { %4418 = sst [smem:[#allocation24_spill]] %s4130_s0  ;;  %s410_s18 = ssub.s32 %s3998_s27, %s4130_s0 }
  0x12   : > { %p423_p0 = scmp.ne.s32.totalorder %s3994_s26, %s3990_s25  ;;  %p411_p1 = scmp.eq.s32.totalorder %s410_s18, 0 }
  0x13   : > { %p424_p2 = scmp.eq.s32.totalorder %s4126_s28, 3  ;;  %p429_p3 = scmp.ne.s32.totalorder %s3990_s25, %s3986_s24 }
  0x14   : > { %p430_p4 = scmp.eq.s32.totalorder %s2706_s29, 3  ;;  %p2707_p7 = scmp.ge.s32.totalorder %s3998_s27, 1 }
  0x15   : > { %s4141_s19 = scalar_select %p411_p1, %s3994_s26, %s413_s30  }
  0x16   : > { %p4143_p5 = por %p424_p2, %p423_p0  ;;  %p4147_p6 = por %p430_p4, %p429_p3 }
  0x17   : > { %4419 = sst [smem:[#allocation25_spill]] %s4141_s19  ;;  %p437_p8 = scmp.lt.s32.totalorder %s3998_s27, 5 }
  0x18   : > { %s4420_s1 = scalar_select %p4143_p5, 1, 0 }
  0x19   : > { %s4422_s20 = scalar_select %p4147_p6, 1, 0 }
  0x1a   : > { %4421 = sst [smem:[#allocation26_spill]] %s4420_s1  ;;  %p3596_p9 = scmp.eq.s32.totalorder %s4126_s28, 0 }
  0x1b   : > { %4423 = sst [smem:[#allocation27_spill]] %s4422_s20  ;;  %p4154_p10 = pnand %p2707_p7, %p437_p8 }
  0x1c   : > { %s4425_s4 = sld [smem:[#allocation30_spill]]  ;;  %s4000_s30 = smov [#allocation5]  }
  0x1d   : > { %p3570_p11 = pneg %p4154_p10  ;;  %s463_s18 = sshll.u32 %s4000_s30, 4  ;;  %s464_s18 = int_to_ptr.vmem [resolvable:$true] %s463_s18 }
  0x1e   : > { %s4426_s6 = sld [smem:[#allocation31_spill]]  ;;  %s4001_s22 = smov [#allocation8]  }
  0x1f   : > { %p4168_p12 = pnand %p3596_p9, %p3570_p11  ;;  %s488_s23 = sshll.u32 %s4001_s22, 4  ;;  %s489_s23 = int_to_ptr.vmem [resolvable:$true] %s488_s23 }
  0x20   : > { %s4002_s30 = smov 96   ;;  %s4004_s24 = smov [#allocation11]  }
  0x21   : > { %s525_s27 = sshll.u32 %s4004_s24, 4  ;;  %s449_s22 = sshll.u32 %s4380_s3, 4  ;;  %s526_s27 = int_to_ptr.vmem [resolvable:$true] %s525_s27  ;;  %s450_s22 = int_to_ptr.hbm [resolvable:$true] %s449_s22 }
  0x22   : > { %s461_s29 = sshll.u32 %s4425_s4, 4  ;;  %s4003_s4 = smov 6   ;;  %s462_s29 = int_to_ptr.hbm [resolvable:$true] %s461_s29 }
  0x23   : > { %3576 = dma.hbm_to_vmem [thread:$0]  (!%p4168_p12), %s462_s29, 16, %s464_s18, [#allocation6]  }
  0x24   : > { %s486_s0 = sshll.u32 %s4426_s6, 4  ;;  %s523_s6 = sshll.u32 %s4388_s11, 4  ;;  %s487_s0 = int_to_ptr.hbm [resolvable:$true] %s486_s0  ;;  %s524_s6 = int_to_ptr.hbm [resolvable:$true] %s523_s6 }
  0x25   : > { %3582 = dma.hbm_to_vmem [thread:$0]  (!%p4168_p12), %s487_s0, 192, %s489_s23, [#allocation9], %s4002_s30, %s4002_s30, %s4003_s4  }
  0x26   : > { %s4405_s25 = smov 64   ;;  %s4407_s29 = smov 4  }
  0x27   : > { %3588 = dma.hbm_to_vmem [thread:$0]  (!%p4168_p12), %s524_s6, 2048, %s526_s27, [#allocation12], %s4405_s25, %s4405_s25, %s4407_s29  }
  0x28   : > { %s4007_s4 = smov [#allocation2]   ;;  %s472_s24 = sshll.u32 %s4382_s5, 4  ;;  %s473_s24 = int_to_ptr.hbm [resolvable:$true] %s472_s24 }
  0x29   : > { %s451_s0 = sshll.u32 %s4007_s4, 4  ;;  %s4008_s17 = smov [#allocation7]   ;;  %s452_s0 = int_to_ptr.vmem [resolvable:$true] %s451_s0 }
  0x2a   : > { %3573 = dma.hbm_to_vmem [thread:$0]  (!%p4168_p12), %s450_s22, 16, %s452_s0, [#allocation3]  }
  0x2b   : > { %s474_s1 = sshll.u32 %s4008_s17, 4  ;;  %s500_s6 = sshll.u32 %s4384_s7, 4  ;;  %s475_s1 = int_to_ptr.vmem [resolvable:$true] %s474_s1  ;;  %s501_s6 = int_to_ptr.hbm [resolvable:$true] %s500_s6 }
  0x2c   : > { %s4009_s27 = smov 384   ;;  %s4010_s19 = smov 24  }
  0x2d   : > { %3579 = dma.hbm_to_vmem [thread:$0]  (!%p4168_p12), %s473_s24, 12288, %s475_s1, [#allocation6], %s4009_s27, %s4009_s27, %s4010_s19  }
  0x2e   : > { %s4011_s4 = smov [#allocation10]   ;;  %s540_s29 = sshll.u32 %s4390_s13, 4  ;;  %s541_s29 = int_to_ptr.hbm [resolvable:$true] %s540_s29 }
  0x2f   : > { %s502_s18 = sshll.u32 %s4011_s4, 4  ;;  %s4428_s22 = smov 4   ;;  %s503_s18 = int_to_ptr.vmem [resolvable:$true] %s502_s18 }
  0x30   : > { %s4429_s0 = smov 64   ;;  %s4012_s17 = smov [#allocation13]  }
  0x31   : > { %3585 = dma.hbm_to_vmem [thread:$0]  (!%p4168_p12), %s501_s6, 4096, %s503_s18, [#allocation9], %s4429_s0, %s4429_s0, %s4428_s22  }
  0x32   : > { %s542_s30 = sshll.u32 %s4012_s17, 4  ;;  %587 = sbr.rel (%p4154_p10) target bundleno = 3811 (0xee3), region = 88  ;;  %s543_s30 = int_to_ptr.vmem [resolvable:$true] %s542_s30 }
  0x33   : > { %3591 = dma.hbm_to_vmem [thread:$0]  (!%p4168_p12), %s541_s29, 2048, %s543_s30, [#allocation12], %s4429_s0, %s4429_s0, %s4428_s22  }
  0x37   : > { %3965 = dma.done.wait (%p3596_p9), [#allocation3], 16  }
  0x38   : > { %3967 = vsyncadd (%p3596_p9), [#allocation3], 4294967280 }
  0x39   : > { %3969 = dma.done.wait (%p3596_p9), [#allocation6], 12304  }
  0x3a   : > { %3971 = vsyncadd (%p3596_p9), [#allocation6], 4294954992 }
  0x3b   : > { %3973 = dma.done.wait (%p3596_p9), [#allocation9], 4288  }
  0x3c   : > { %3975 = vsyncadd (%p3596_p9), [#allocation9], 4294963008 }
  0x3d   : > { %3977 = dma.done.wait (%p3596_p9), [#allocation12], 4096  }
  0x3e   : > { %3979 = vsyncadd (%p3596_p9), [#allocation12], 4294963200  ;;  %p675_p13 = scmp.lt.s32.totalorder %s4126_s28, 3  ;;  %v690_v0 = vlaneseq  ;;  %s4430_s24 = sld [smem:[#allocation28_spill]]  ;;  %v4013_v2 = vmov 0.0   ;;  %vm1147_vm4 = vcmask 1043456  }
  0x3f   : > { %v2897_v6 = vld [vmem:[#allocation7 + $0x150] sm:$0xf]  ;;  %v3425_v7 = vld [vmem:[#allocation7 + $0x164] sm:$0xf0]  ;;  %v3422_v8 = vld [vmem:[#allocation7 + $0x154] sm:$0xf] }
  0x40   : > { %s4230_s25 = scalar_select %p675_p13, %s4126_s28, 3  ;;  %v691_v1 = vand.u32 127, %v690_v0  ;;  %v2898_v9 = vor.u32 %v3425_v7, %v2897_v6  ;;  %v2899_v10 = vld [vmem:[#allocation7 + $0x168] sm:$0xf0]  ;;  %v2873_v11 = vld [vmem:[#allocation7 + $0x120] sm:$0xf] }
  0x41   : > { %v3419_v12 = vld [vmem:[#allocation7 + $0x134] sm:$0xf0]  ;;  %v2902_v13 = vor.u32 %v3422_v8, %v2899_v10  ;;  %v3416_v14 = vld [vmem:[#allocation7 + $0x124] sm:$0xf]  ;;  %v2875_v15 = vld [vmem:[#allocation7 + $0x138] sm:$0xf0] }
  0x42   : > { %s2724_s20 = sshll.u32 %s4230_s25, 3  ;;  %vm692_vm0 = vcmp.lt.s32.totalorder %v691_v1, 32  ;;  %1032 = vmatpush.bf16.msra.mxu0 %v2898_v9  ;;  %v2874_v16 = vor.u32 %v3419_v12, %v2873_v11  ;;  %v2878_v17 = vor.u32 %v3416_v14, %v2875_v15  ;;  %v2849_v18 = vld [vmem:[#allocation7 + $0xf0] sm:$0xf]  ;;  %v3413_v19 = vld [vmem:[#allocation7 + $0x104] sm:$0xf0]  ;;  %s685_s27 = scalar_lea.vmem %s4379_s2, %s4230_s25 }
  0x43   : > { %v4238_v3 = vsel %vm692_vm0, 1.0, %v4013_v2  ;;  %1045 = vmatpush.bf16.msra.mxu1 %v2902_v13  ;;  %v3410_v20 = vld [vmem:[#allocation7 + $0xf4] sm:$0xf]  ;;  %v2851_v21 = vld [vmem:[#allocation7 + $0x108] sm:$0xf0]  ;;  %v2850_v27 = vor.u32 %v3413_v19, %v2849_v18  ;;  %vm1130_vm5 = vcmask 64512  }
  0x44   : > { %s678_s1 = scalar_lea.vmem %s4430_s24, %s2724_s20  ;;  %v2905_v22 = vld [vmem:[#allocation7 + $0x158] sm:$0xf]  ;;  %v3426_v23 = vld [vmem:[#allocation7 + $0x16c] sm:$0xf0]  ;;  %v3423_v25 = vld [vmem:[#allocation7 + $0x15c] sm:$0xf]  ;;  %v2854_v29 = vor.u32 %v3410_v20, %v2851_v21 }
  0x45   : > { %v687_v4 = vld [vmem:[%s678_s1] sm:$0xff]  ;;  %v2906_v24 = vor.u32 %v3426_v23, %v2905_v22  ;;  %v2907_v26 = vld [vmem:[#allocation7 + $0x170] sm:$0xf0]  ;;  %v3407_v31 = vld [vmem:[#allocation7 + $0xd4] sm:$0xf0]  ;;  %s4431_s1 = sld [smem:[#allocation29_spill]] }
  0x46   : > { %v697_v5 = vmul.f32 %v4238_v3, %v687_v4  ;;  %1033 = vmatpush.bf16.msra.mxu0 %v2874_v16  ;;  %v2910_v28 = vor.u32 %v3423_v25, %v2907_v26  ;;  %v2825_v30 = vld [vmem:[#allocation7 + $0xc0] sm:$0xf]  ;;  %v3404_v32 = vld [vmem:[#allocation7 + $0xc4] sm:$0xf]  ;;  %v2827_v33 = vld [vmem:[#allocation7 + $0xd8] sm:$0xf0] }
  0x47   : > { %1046 = vmatpush.bf16.msra.mxu1 %v2878_v17  ;;  %1058 = vmatpush.bf16.msra.mxu2 %v2906_v24  ;;  %v2826_v34 = vor.u32 %v3407_v31, %v2825_v30  ;;  %v2830_v35 = vor.u32 %v3404_v32, %v2827_v33  ;;  %v2801_v41 = vld [vmem:[#allocation7 + $0x90] sm:$0xf]  ;;  %v3401_v42 = vld [vmem:[#allocation7 + $0xa4] sm:$0xf0]  ;;  %v3398_v43 = vld [vmem:[#allocation7 + $0x94] sm:$0xf] }
  0x48   : > { %698 = vadd.xlane.f32.xlu0 %v697_v5  ;;  %1071 = vmatpush.bf16.msra.mxu3 %v2910_v28  ;;  %v2802_v44 = vor.u32 %v3401_v42, %v2801_v41  ;;  %v2803_v45 = vld [vmem:[#allocation7 + $0xa8] sm:$0xf0]  ;;  %v2881_v46 = vld [vmem:[#allocation7 + $0x128] sm:$0xf]  ;;  %v3420_v47 = vld [vmem:[#allocation7 + $0x13c] sm:$0xf0] }
  0x49   : > { %v2806_v48 = vor.u32 %v3398_v43, %v2803_v45  ;;  %v2882_v49 = vor.u32 %v3420_v47, %v2881_v46  ;;  %v3417_v50 = vld [vmem:[#allocation7 + $0x12c] sm:$0xf]  ;;  %v2883_v51 = vld [vmem:[#allocation7 + $0x140] sm:$0xf0]  ;;  %v2777_v53 = vld [vmem:[#allocation7 + $0x60] sm:$0xf] }
  0x4a   : > { %1034 = vmatpush.bf16.msra.mxu0 %v2850_v27  ;;  %v2886_v52 = vor.u32 %v3417_v50, %v2883_v51  ;;  %v3395_v54 = vld [vmem:[#allocation7 + $0x74] sm:$0xf0]  ;;  %v3392_v55 = vld [vmem:[#allocation7 + $0x64] sm:$0xf]  ;;  %v2779_v57 = vld [vmem:[#allocation7 + $0x78] sm:$0xf0] }
  0x4b   : > { %1047 = vmatpush.bf16.msra.mxu1 %v2854_v29  ;;  %1059 = vmatpush.bf16.msra.mxu2 %v2882_v49  ;;  %v2778_v56 = vor.u32 %v3395_v54, %v2777_v53  ;;  %v2857_v58 = vld [vmem:[#allocation7 + $0xf8] sm:$0xf]  ;;  %v3414_v59 = vld [vmem:[#allocation7 + $0x10c] sm:$0xf0]  ;;  %v2782_v60 = vor.u32 %v3392_v55, %v2779_v57  ;;  %v3411_v62 = vld [vmem:[#allocation7 + $0xfc] sm:$0xf]  ;;  %s682_s26 = scalar_lea.vmem %s4431_s1, %s2724_s20 }
  0x4c   : > { %1072 = vmatpush.bf16.msra.mxu3 %v2886_v52  ;;  %v2858_v61 = vor.u32 %v3414_v59, %v2857_v58  ;;  %v2859_v63 = vld [vmem:[#allocation7 + $0x110] sm:$0xf0]  ;;  %v2753_v1 = vld [vmem:[#allocation7 + $0x30] sm:$0xf]  ;;  %v3389_v2 = vld [vmem:[#allocation7 + $0x44] sm:$0xf0] }
  0x4d   : > { %v2862_v0 = vor.u32 %v3411_v62, %v2859_v63  ;;  %v2754_v5 = vor.u32 %v3389_v2, %v2753_v1  ;;  %v2755_v6 = vld [vmem:[#allocation7 + $0x48] sm:$0xf0]  ;;  %v2833_v7 = vld [vmem:[#allocation7 + $0xc8] sm:$0xf]  ;;  %v3408_v8 = vld [vmem:[#allocation7 + $0xdc] sm:$0xf0] }
  0x4e   : > { %1035 = vmatpush.bf16.msra.mxu0 %v2826_v34  ;;  %v2834_v10 = vor.u32 %v3408_v8, %v2833_v7  ;;  %v3405_v11 = vld [vmem:[#allocation7 + $0xcc] sm:$0xf]  ;;  %v2835_v12 = vld [vmem:[#allocation7 + $0xe0] sm:$0xf0]  ;;  %v2729_v14 = vld [vmem:[#allocation7] sm:$0xf] }
  0x4f   : > { %1048 = vmatpush.bf16.msra.mxu1 %v2830_v35  ;;  %1060 = vmatpush.bf16.msra.mxu2 %v2858_v61  ;;  %v2838_v13 = vor.u32 %v3405_v11, %v2835_v12  ;;  %v3383_v15 = vld [vmem:[#allocation7 + $0x14] sm:$0xf0]  ;;  %v3380_v16 = vld [vmem:[#allocation7 + $0x4] sm:$0xf]  ;;  %v2731_v18 = vld [vmem:[#allocation7 + $0x18] sm:$0xf0] }
  0x50   : > { %1073 = vmatpush.bf16.msra.mxu3 %v2862_v0  ;;  %v2730_v17 = vor.u32 %v3383_v15, %v2729_v14  ;;  %v2809_v19 = vld [vmem:[#allocation7 + $0x98] sm:$0xf]  ;;  %v3402_v20 = vld [vmem:[#allocation7 + $0xac] sm:$0xf0]  ;;  %v2734_v21 = vor.u32 %v3380_v16, %v2731_v18  ;;  %v3399_v23 = vld [vmem:[#allocation7 + $0x9c] sm:$0xf] }
  0x51   : > { %v2810_v22 = vor.u32 %v3402_v20, %v2809_v19  ;;  %v2811_v24 = vld [vmem:[#allocation7 + $0xb0] sm:$0xf0]  ;;  %v2913_v25 = vld [vmem:[#allocation7 + $0x160] sm:$0xf]  ;;  %v3427_v27 = vld [vmem:[#allocation7 + $0x174] sm:$0xf0] }
  0x52   : > { %1036 = vmatpush.bf16.msra.mxu0 %v2802_v44  ;;  %v2814_v26 = vor.u32 %v3399_v23, %v2811_v24  ;;  %v3424_v28 = vld [vmem:[#allocation7 + $0x164] sm:$0xf]  ;;  %v2915_v29 = vld [vmem:[#allocation7 + $0x178] sm:$0xf0]  ;;  %v2914_v30 = vor.u32 %v3427_v27, %v2913_v25  ;;  %v2785_v32 = vld [vmem:[#allocation7 + $0x68] sm:$0xf] }
  0x53   : > { %1049 = vmatpush.bf16.msra.mxu1 %v2806_v48  ;;  %1061 = vmatpush.bf16.msra.mxu2 %v2834_v10  ;;  %v2918_v31 = vor.u32 %v3424_v28, %v2915_v29  ;;  %v3396_v33 = vld [vmem:[#allocation7 + $0x7c] sm:$0xf0]  ;;  %v3393_v34 = vld [vmem:[#allocation7 + $0x6c] sm:$0xf]  ;;  %v3418_v42 = vld [vmem:[#allocation7 + $0x134] sm:$0xf] }
  0x54   : > { %1074 = vmatpush.bf16.msra.mxu3 %v2838_v13  ;;  %v2786_v35 = vor.u32 %v3396_v33, %v2785_v32  ;;  %v2891_v43 = vld [vmem:[#allocation7 + $0x148] sm:$0xf0]  ;;  %v2761_v45 = vld [vmem:[#allocation7 + $0x38] sm:$0xf]  ;;  %v3390_v46 = vld [vmem:[#allocation7 + $0x4c] sm:$0xf0] }
  0x55   : > { %v2894_v44 = vor.u32 %v3418_v42, %v2891_v43  ;;  %v3387_v47 = vld [vmem:[#allocation7 + $0x3c] sm:$0xf]  ;;  %v2762_v48 = vor.u32 %v3390_v46, %v2761_v45  ;;  %v2763_v49 = vld [vmem:[#allocation7 + $0x50] sm:$0xf0]  ;;  %v2865_v50 = vld [vmem:[#allocation7 + $0x100] sm:$0xf] }
  0x56   : > { %1037 = vmatpush.bf16.msra.mxu0 %v2778_v56  ;;  %v3415_v51 = vld [vmem:[#allocation7 + $0x114] sm:$0xf0]  ;;  %v2766_v52 = vor.u32 %v3387_v47, %v2763_v49  ;;  %v3412_v54 = vld [vmem:[#allocation7 + $0x104] sm:$0xf]  ;;  %v2867_v55 = vld [vmem:[#allocation7 + $0x118] sm:$0xf0] }
  0x57   : > { %1050 = vmatpush.bf16.msra.mxu1 %v2782_v60  ;;  %1062 = vmatpush.bf16.msra.mxu2 %v2810_v22  ;;  %v2866_v53 = vor.u32 %v3415_v51, %v2865_v50  ;;  %v2870_v56 = vor.u32 %v3412_v54, %v2867_v55  ;;  %v2737_v57 = vld [vmem:[#allocation7 + $0x8] sm:$0xf]  ;;  %v3384_v58 = vld [vmem:[#allocation7 + $0x1c] sm:$0xf0]  ;;  %v3381_v59 = vld [vmem:[#allocation7 + $0xc] sm:$0xf] }
  0x58   : > { %1075 = vmatpush.bf16.msra.mxu3 %v2814_v26  ;;  %v2738_v60 = vor.u32 %v3384_v58, %v2737_v57  ;;  %v2739_v61 = vld [vmem:[#allocation7 + $0x20] sm:$0xf0]  ;;  %v2841_v62 = vld [vmem:[#allocation7 + $0xd0] sm:$0xf]  ;;  %v3409_v63 = vld [vmem:[#allocation7 + $0xe4] sm:$0xf0] }
  0x59   : > { %v2742_v0 = vor.u32 %v3381_v59, %v2739_v61  ;;  %v2842_v1 = vor.u32 %v3409_v63, %v2841_v62  ;;  %v3406_v2 = vld [vmem:[#allocation7 + $0xd4] sm:$0xf]  ;;  %v3403_v7 = vld [vmem:[#allocation7 + $0xb4] sm:$0xf0]  ;;  %v3400_v8 = vld [vmem:[#allocation7 + $0xa4] sm:$0xf] }
  0x5a   : > { %1038 = vmatpush.bf16.msra.mxu0 %v2754_v5  ;;  %v2819_v10 = vld [vmem:[#allocation7 + $0xb8] sm:$0xf0]  ;;  %v2793_v13 = vld [vmem:[#allocation7 + $0x70] sm:$0xf]  ;;  %v3397_v14 = vld [vmem:[#allocation7 + $0x84] sm:$0xf0] }
  0x5b   : > { %1063 = vmatpush.bf16.msra.mxu2 %v2786_v35  ;;  %v2822_v12 = vor.u32 %v3400_v8, %v2819_v10  ;;  %v3394_v15 = vld [vmem:[#allocation7 + $0x74] sm:$0xf]  ;;  %v2794_v18 = vor.u32 %v3397_v14, %v2793_v13  ;;  %v2769_v20 = vld [vmem:[#allocation7 + $0x40] sm:$0xf]  ;;  %v3388_v23 = vld [vmem:[#allocation7 + $0x44] sm:$0xf] }
  0x5c   : > { %v2771_v24 = vld [vmem:[#allocation7 + $0x58] sm:$0xf0]  ;;  %v2745_v27 = vld [vmem:[#allocation7 + $0x10] sm:$0xf]  ;;  %v3385_v28 = vld [vmem:[#allocation7 + $0x24] sm:$0xf0] }
  0x5d   : > { %v2774_v26 = vor.u32 %v3388_v23, %v2771_v24  ;;  %v3382_v29 = vld [vmem:[#allocation7 + $0x14] sm:$0xf]  ;;  %v3661_v42 = vld [vmem:[#allocation5] ss:$0 sm:$0xff]  ;;  %v778_v49 = vld [vmem:[#allocation8] sm:$0x3f] }
  0x5e   : > { %1039 = vmatpush.bf16.msra.mxu0 %v2730_v17  ;;  %v2795_v17 = vld [vmem:[#allocation7 + $0x88] sm:$0xf0]  ;;  %v782_v50 = vperm.slane %v778_v49, 2  ;;  %v783_v51 = vperm.slane %v778_v49, 3  ;;  %v780_v57 = vperm.slane %v778_v49, 0  ;;  %v784_v61 = vperm.slane %v778_v49, 4 }
  0x5f   : > { %1064 = vmatpush.bf16.msra.mxu2 %v2762_v48  ;;  %v2798_v19 = vor.u32 %v3394_v15, %v2795_v17  ;;  %v785_v62 = vperm.slane %v778_v49, 5  ;;  %v781_v13 = vperm.slane %v778_v49, 1  ;;  %v3432_v49 = vld [vmem:[#allocation10 + $0x20] sm:$0xff]  ;;  %vm2514_vm15 = vcmask 7168   ;;  %s4432_s19 = sld [smem:[#allocation21_spill]] }
  0x60   : > { %s4433_s22 = sld [smem:[#allocation32_spill]] }
  0x62   : > { %1084 = vmatpush.bf16.msrb.mxu0 %v2914_v30  ;;  %v2747_v30 = vld [vmem:[#allocation7 + $0x28] sm:$0xf0] }
  0x63   : > { %1065 = vmatpush.bf16.msra.mxu2 %v2738_v60  ;;  %v2750_v32 = vor.u32 %v3382_v29, %v2747_v30 }
  0x65   : > { %s673_s4 = sand.u32 1, %s4432_s19  }
  0x66   : > { %s2557_s0 = scalar_lea.hbm %s4433_s22, %s4126_s28  ;;  %s674_s30 = scalar_lea.vmem [#allocation14], %s673_s4 }
  0x67   : > { %s2559_s21 = sshll.u32 %s674_s30, 4  ;;  %s2561_s29 = sshll.u32 %s2557_s0, 4  ;;  %s2560_s21 = int_to_ptr.vmem [resolvable:$true] %s2559_s21  ;;  %s2562_s29 = int_to_ptr.hbm [resolvable:$true] %s2561_s29 }
  0x68   : > { %s2549_s24 = scalar_lea.sflag [#allocation4], %s673_s4  ;;  %s3934_s1 = sshra.s32 %s2562_s29, 4  ;;  %s3935_s1 = int_to_ptr.hbm [resolvable:$true] %s3934_s1 }
  0x69   : > { %s3936_s28 = scalar_lea.hbm %s3935_s1, 1  ;;  %s3940_s20 = scalar_lea.hbm %s4433_s22, 4 }
  0x6a   : > { %p3937_p0 = scmp.ne.s32.totalorder %s3935_s1, %s3936_s28  ;;  %p3941_p3 = scmp.lt.s32.totalorder %s3935_s1, %s4433_s22 }
  0x6b   : > { %p3942_p4 = scmp.lt.s32.totalorder %s3940_s20, %s3936_s28 }
  0x6c   : > { %p3938_p1 = pnand %p3937_p0, %p4143_p5 }
  0x6d   : > { %p3943_p7 = por %p3942_p4, %p3941_p3 }
  0x6e   : > { %p3939_p2 = pneg %p3938_p1 }
  0x70   : > { %p3944_p8 = pnand %p3943_p7, %p3939_p2 }
  0xbb   : > { %v699_v36 = vpop.xlane.xlu0 %698 }
  0xbc   : > { %v700_v37 = vmul.f32 0.03125, %v699_v36  ;;  %v2787_v36 = vld [vmem:[#allocation7 + $0x80] sm:$0xf0] }
  0xbe   : > { %v701_v38 = vsub.f32 %v687_v4, %v700_v37  ;;  %v3386_v4 = vld [vmem:[#allocation7 + $0x34] sm:$0xf]  ;;  %v2889_v37 = vld [vmem:[#allocation7 + $0x130] sm:$0xf] }
  0xbf   : > { %v2758_v9 = vor.u32 %v3386_v4, %v2755_v6  ;;  %v2843_v4 = vld [vmem:[#allocation7 + $0xe8] sm:$0xf0]  ;;  %v2817_v6 = vld [vmem:[#allocation7 + $0xa0] sm:$0xf] }
  0xc0   : > { %v4242_v39 = vmul.f32 %v4238_v3, %v701_v38  ;;  %v3421_v38 = vld [vmem:[#allocation7 + $0x144] sm:$0xf0]  ;;  %v2846_v5 = vor.u32 %v3406_v2, %v2843_v4 }
  0xc1   : > { %1051 = vmatpush.bf16.msra.mxu1 %v2758_v9  ;;  %v2890_v41 = vor.u32 %v3421_v38, %v2889_v37  ;;  %v2818_v9 = vor.u32 %v3403_v7, %v2817_v6 }
  0xc2   : > { %v703_v40 = vmul.f32 %v4242_v39, %v4242_v39 }
  0xc3   : > { %1085 = vmatpush.bf16.msrb.mxu0 %v2890_v41 }
  0xc4   : > { %704 = vadd.xlane.f32.xlu0 %v703_v40  ;;  %v2790_v40 = vor.u32 %v3393_v34, %v2787_v36 }
  0xc5   : > { %1052 = vmatpush.bf16.msra.mxu1 %v2734_v21  ;;  %v3391_v21 = vld [vmem:[#allocation7 + $0x54] sm:$0xf0] }
  0xc6   : > { %1076 = vmatpush.bf16.msra.mxu3 %v2790_v40  ;;  %v2770_v25 = vor.u32 %v3391_v21, %v2769_v20  ;;  %v3660_v40 = vld [vmem:[#allocation2] ss:$0 sm:$0xff] }
  0xc7   : > { %1086 = vmatpush.bf16.msrb.mxu0 %v2866_v53 }
  0xc9   : > { %1097 = vmatpush.bf16.msrb.mxu1 %v2918_v31  ;;  %v2746_v31 = vor.u32 %v3385_v28, %v2745_v27 }
  0xca   : > { %1077 = vmatpush.bf16.msra.mxu3 %v2766_v52 }
  0xcb   : > { %1087 = vmatpush.bf16.msrb.mxu0 %v2842_v1 }
  0xcd   : > { %1098 = vmatpush.bf16.msrb.mxu1 %v2894_v44 }
  0xce   : > { %1078 = vmatpush.bf16.msra.mxu3 %v2742_v0 }
  0xcf   : > { %1088 = vmatpush.bf16.msrb.mxu0 %v2818_v9 }
  0xd1   : > { %1099 = vmatpush.bf16.msrb.mxu1 %v2870_v56 }
  0xd3   : > { %1089 = vmatpush.bf16.msrb.mxu0 %v2794_v18 }
  0xd5   : > { %1100 = vmatpush.bf16.msrb.mxu1 %v2846_v5 }
  0xd7   : > { %1090 = vmatpush.bf16.msrb.mxu0 %v2770_v25 }
  0xd9   : > { %1101 = vmatpush.bf16.msrb.mxu1 %v2822_v12 }
  0xdb   : > { %1091 = vmatpush.bf16.msrb.mxu0 %v2746_v31 }
  0xdd   : > { %1102 = vmatpush.bf16.msrb.mxu1 %v2798_v19 }
  0xe1   : > { %1103 = vmatpush.bf16.msrb.mxu1 %v2774_v26 }
  0xe5   : > { %1104 = vmatpush.bf16.msrb.mxu1 %v2750_v32 }
 0x137   : > { %v705_v11 = vpop.xlane.xlu0 %704 }
 0x138   : > { %v706_v16 = vmul.f32 0.03125, %v705_v11 }
 0x13a   : > { %v707_v22 = vadd.f32 1e-12, %v706_v16  ;;  %v689_v16 = vld [vmem:[%s685_s27] sm:$0x1] }
 0x13b   : > { %v727_v17 = vsub.f32 1.0, %v689_v16 }
 0x13c   : > { %3676 = vrsqrt.f32 %v707_v22  ;;  %vm714_vm2 = vweird.f32 %v707_v22 }
 0x13d   : > { %v728_v18 = vmul.f32 -10000.0, %v727_v17  ;;  %v3451_v17 = vld [vmem:[#allocation11 + $0x38] sm:$0xff] }
 0x13f   : > { %v4257_v19 = vperm.slane %v728_v18, 0 }
 0x142   : > { %v3677_v33 = vpop.eup %3676 }
 0x143   : > { %v709_v34 = vmul.f32 %v3677_v33, %v707_v22  ;;  %vm715_vm1 = vweird.f32 %v3677_v33 }
 0x144   : > { %vm716_vm3 = vmor %vm714_vm2, %vm715_vm1 }
 0x145   : > { %v710_v35 = vmul.f32 %v3677_v33, %v709_v34 }
 0x147   : > { %v711_v36 = vmul.f32 0.5, %v710_v35 }
 0x149   : > { %v712_v37 = vsub.f32 1.5, %v711_v36 }
 0x14b   : > { %v713_v38 = vmul.f32 %v3677_v33, %v712_v37 }
 0x14d   : > { %v717_v41 = vsel %vm716_vm3, %v3677_v33, %v713_v38 }
 0x14e   : > { %v718_v43 = vmul.f32 %v717_v41, %v4242_v39  ;;  %v3435_v41 = vld [vmem:[#allocation10 + $0x38] sm:$0xff] }
 0x150   : > { %v722_v44 = vmul.f32 %v3660_v40, %v718_v43  ;;  %v3434_v43 = vld [vmem:[#allocation10 + $0x30] sm:$0xff] }
 0x152   : > { %v4247_v45 = vadd.f32 %v3661_v42, %v722_v44  ;;  %v3443_v42 = vld [vmem:[#allocation10 + $0x78] sm:$0xff]  ;;  %v3442_v44 = vld [vmem:[#allocation10 + $0x70] sm:$0xff] }
 0x154   : > { %v777_v46 = vpack.c.bf16 %v4247_v45, %v4247_v45 }
 0x156   : > { %1040 = vmatmul.bf16.vlgmr.msra.gmra.mxu0 %v777_v46  ;;  %1053 = vmatmul.bf16.vlgmr.msra.gmra.mxu1 %v777_v46 }
 0x157   : > { %1066 = vmatmul.bf16.vlgmr.msra.gmra.mxu2 %v777_v46  ;;  %1079 = vmatmul.bf16.vlgmr.msra.gmra.mxu3 %v777_v46 }
 0x158   : > { %1347 = vmatpush.bf16.msra.mxu0 %v3435_v41  ;;  %1360 = vmatpush.bf16.msra.mxu1 %v3443_v42  ;;  %v3663_v41 = vld [vmem:[%s4386_s9] ss:$0 sm:$0xff] }
 0x15c   : > { %1348 = vmatpush.bf16.msra.mxu0 %v3434_v43  ;;  %1361 = vmatpush.bf16.msra.mxu1 %v3442_v44  ;;  %v3664_v44 = vld [vmem:[%s4387_s10] ss:$0 sm:$0xff] }
 0x166   : > { %1092 = vmatmul.bf16.vlgmr.msrb.gmra.mxu0 %v777_v46  ;;  %1105 = vmatmul.bf16.vlgmr.msrb.gmra.mxu1 %v777_v46 }
 0x1d3   : > { %v1041_v47 = vpop.f32.mrf.mxu0  ;;  %v1054_v48 = vpop.f32.mrf.mxu1 }
 0x1d4   : > { %v1042_v60 = vadd.f32 %v1041_v47, %v780_v57  ;;  %v1055_v14 = vadd.f32 %v1054_v48, %v781_v13  ;;  %v3433_v47 = vld [vmem:[#allocation10 + $0x28] sm:$0xff] }
 0x1d5   : > { %v3441_v48 = vld [vmem:[#allocation10 + $0x68] sm:$0xff]  ;;  %1349 = vmatpush.bf16.msra.mxu0 %v3433_v47 }
 0x1d6   : > { %v1110_v4 = vpack.c.bf16 %v1042_v60, %v1042_v60  ;;  %v1164_v15 = vpack.c.bf16 %v1055_v14, %v1055_v14  ;;  %1362 = vmatpush.bf16.msra.mxu1 %v3441_v48  ;;  %v3440_v60 = vld [vmem:[#allocation10 + $0x60] sm:$0xff] }
 0x1d9   : > { %1350 = vmatpush.bf16.msra.mxu0 %v3432_v49  ;;  %v3458_v49 = vld [vmem:[#allocation13 + $0x30] sm:$0xff] }
 0x1da   : > { %v1067_v52 = vpop.f32.mrf.mxu2  ;;  %v1080_v53 = vpop.f32.mrf.mxu3  ;;  %1363 = vmatpush.bf16.msra.mxu1 %v3440_v60 }
 0x1db   : > { %v1068_v39 = vadd.f32 %v1067_v52, %v782_v50  ;;  %v1081_v54 = vadd.f32 %v1080_v53, %v783_v51  ;;  %v1043_v55 = vpop.f32.mrf.mxu0  ;;  %v1056_v56 = vpop.f32.mrf.mxu1  ;;  %v3431_v53 = vld [vmem:[#allocation10 + $0x18] sm:$0xff] }
 0x1dc   : > { %v3429_v55 = vld [vmem:[#allocation10 + $0x8] sm:$0xff] }
 0x1dd   : > { %v1111_v58 = vpack.c.bf16 %v1068_v39, %v1068_v39  ;;  %v1165_v59 = vpack.c.bf16 %v1081_v54, %v1081_v54  ;;  %1351 = vmatpush.bf16.msra.mxu0 %v3431_v53  ;;  %v3430_v39 = vld [vmem:[#allocation10 + $0x10] sm:$0xff] }
 0x1de   : > { %v3454_v53 = vld [vmem:[#allocation13 + $0x10] sm:$0xff] }
 0x1df   : > { %1119 = vmatpush.bf16.xpose.msrb.mxu2 %v1111_v58 }
 0x1e1   : > { %1352 = vmatpush.bf16.msra.mxu0 %v3430_v39  ;;  %v3453_v39 = vld [vmem:[#allocation13 + $0x8] sm:$0xff] }
 0x1e2   : > { %v1069_v63 = vpop.f32.mrf.mxu2  ;;  %v1082_v0 = vpop.f32.mrf.mxu3 }
 0x1e3   : > { %v1093_v1 = vpop.f32.mrf.mxu0  ;;  %v1106_v2 = vpop.f32.mrf.mxu1  ;;  %v3437_v63 = vld [vmem:[#allocation10 + $0x48] sm:$0xff]  ;;  %v3436_v0 = vld [vmem:[#allocation10 + $0x40] sm:$0xff] }
 0x1e4   : > { %v1094_v5 = vadd.f32 %v1093_v1, %v784_v61  ;;  %v1107_v6 = vadd.f32 %v1106_v2, %v785_v62  ;;  %v3439_v61 = vld [vmem:[#allocation10 + $0x58] sm:$0xff]  ;;  %v3438_v62 = vld [vmem:[#allocation10 + $0x50] sm:$0xff] }
 0x1e5   : > { %1353 = vmatpush.bf16.msra.mxu0 %v3429_v55  ;;  %1364 = vmatpush.bf16.msra.mxu1 %v3439_v61  ;;  %v3665_v55 = vld [vmem:[%s4389_s12] ss:$0 sm:$0xff] }
 0x1e6   : > { %v1143_v7 = vpack.c.bf16 %v1094_v5, %v1094_v5  ;;  %v1193_v8 = vpack.c.bf16 %v1107_v6, %v1107_v6  ;;  %1120 = vmatmul.bf16.vlgmr.msrb.gmra.mxu2 %v1110_v4 }
 0x1e7   : > { %1173 = vmatpush.bf16.xpose.msra.mxu2 %v1165_v59  ;;  %v3428_v59 = vld [vmem:[#allocation10] sm:$0xff] }
 0x1e8   : > { %v1198_v9 = vsel %vm1147_vm4, %v1193_v8, 0  ;;  %v1149_v10 = vsel %vm1147_vm4, %v1143_v7, 0 }
 0x1e9   : > { %1158 = vmatpush.bf16.msrb.mxu3 %v1149_v10  ;;  %1354 = vmatpush.bf16.msra.mxu0 %v3428_v59  ;;  %v3662_v10 = vld [vmem:[%s4385_s8] ss:$0 sm:$0xff] }
 0x1ea   : > { %1365 = vmatpush.bf16.msra.mxu1 %v3438_v62 }
 0x1eb   : > { %v1095_v11 = vpop.f32.mrf.mxu0  ;;  %v1108_v12 = vpop.f32.mrf.mxu1 }
 0x1ed   : > { %1207 = vmatpush.bf16.msra.mxu3 %v1198_v9 }
 0x1ee   : > { %1366 = vmatpush.bf16.msra.mxu1 %v3437_v63 }
 0x1ef   : > { %1475 = vmatpush.bf16.msrb.mxu2 %v3451_v17  ;;  %v3195_v17 = vld [vmem:[#allocation7 + $0x2a0] sm:$0xf] }
 0x1f2   : > { %1367 = vmatpush.bf16.msra.mxu1 %v3436_v0 }
 0x1f6   : > { %1174 = vmatmul.bf16.vlgmr.msra.gmra.mxu2 %v1164_v15 }
 0x269   : > { %v1121_v20 = vpop.f32.mrf.mxu2 }
 0x26a   : > { %v1125_v21 = vmul.f32 0.25, %v1121_v20 }
 0x26c   : > { %v1129_v22 = vadd.f32 %v4257_v19, %v1125_v21 }
 0x26e   : > { %v1131_v23 = vsel %vm1130_vm5, %v1129_v22, -inf }
 0x26f   : > { %1132 = vmax.xlane.f32.xlu1 %v1131_v23 }
 0x271   : > { %v1123_v24 = vpop.f32.mrf.mxu2 }
 0x272   : > { %v3450_v24 = vld [vmem:[#allocation11 + $0x30] sm:$0xff] }
 0x273   : > { %1476 = vmatpush.bf16.msrb.mxu2 %v3450_v24 }
 0x279   : > { %v1175_v25 = vpop.f32.mrf.mxu2 }
 0x27a   : > { %v1179_v26 = vmul.f32 0.25, %v1175_v25  ;;  %v3449_v25 = vld [vmem:[#allocation11 + $0x28] sm:$0xff] }
 0x27b   : > { %1477 = vmatpush.bf16.msrb.mxu2 %v3449_v25  ;;  %v3171_v25 = vld [vmem:[#allocation7 + $0x270] sm:$0xf] }
 0x27c   : > { %v1180_v27 = vadd.f32 %v1179_v26, %v4257_v19  ;;  %v3448_v26 = vld [vmem:[#allocation11 + $0x20] sm:$0xff] }
 0x27e   : > { %v1181_v28 = vsel %vm1130_vm5, %v1180_v27, -inf }
 0x27f   : > { %1182 = vmax.xlane.f32.xlu1 %v1181_v28  ;;  %1478 = vmatpush.bf16.msrb.mxu2 %v3448_v26  ;;  %v3445_v28 = vld [vmem:[#allocation11 + $0x8] sm:$0xff]  ;;  %v3493_v26 = vld [vmem:[#allocation7 + $0x284] sm:$0xf0] }
 0x281   : > { %v1177_v29 = vpop.f32.mrf.mxu2 }
 0x282   : > { %v3444_v29 = vld [vmem:[#allocation11] sm:$0xff] }
 0x2e2   : > { %v1133_v30 = vpop.xlane.xlu1 %1132 }
 0x2e3   : > { %v1134_v31 = vsub.f32 %v1129_v22, %v1133_v30  ;;  %v3459_v30 = vld [vmem:[#allocation13 + $0x38] sm:$0xff] }
 0x2e5   : > { %v1135_v32 = vmul.f32 1.442695, %v1134_v31 }
 0x2e7   : > { %3678 = vpow2.f32 %v1135_v32 }
 0x2ed   : > { %v3679_v33 = vpop.eup %3678 }
 0x2ee   : > { %v1137_v34 = vsel %vm1130_vm5, %v3679_v33, 0.0 }
 0x2ef   : > { %1138 = vadd.xlane.f32.xlu2 %v1137_v34 }
 0x2f2   : > { %v1183_v35 = vpop.xlane.xlu1 %1182 }
 0x2f3   : > { %v1184_v36 = vsub.f32 %v1180_v27, %v1183_v35  ;;  %v3446_v27 = vld [vmem:[#allocation11 + $0x10] sm:$0xff] }
 0x2f5   : > { %v1185_v37 = vmul.f32 1.442695, %v1184_v36 }
 0x2f7   : > { %3680 = vpow2.f32 %v1185_v37 }
 0x2fd   : > { %v3681_v38 = vpop.eup %3680 }
 0x2fe   : > { %v1187_v40 = vsel %vm1130_vm5, %v3681_v38, 0.0 }
 0x2ff   : > { %1188 = vadd.xlane.f32.xlu2 %v1187_v40 }
 0x362   : > { %v1139_v46 = vpop.xlane.xlu2 %1138 }
 0x363   : > { %3682 = vrcp.f32 %v1139_v46 }
 0x369   : > { %v3683_v50 = vpop.eup %3682 }
 0x36a   : > { %v1141_v51 = vmul.f32 %v3683_v50, %v3679_v33  ;;  %v3457_v50 = vld [vmem:[#allocation13 + $0x28] sm:$0xff] }
 0x36c   : > { %v1142_v52 = vpack.c.bf16 %v1141_v51, %v1141_v51  ;;  %v3456_v51 = vld [vmem:[#allocation13 + $0x20] sm:$0xff] }
 0x36e   : > { %2919 = vmatmul.msk.bf16.vlgmr.msrb.gmra.mxu3 %vm1130_vm5, %v1142_v52  ;;  %v3455_v52 = vld [vmem:[#allocation13 + $0x18] sm:$0xff] }
 0x36f   : > { %1566 = vmatpush.bf16.msrb.mxu3 %v3459_v30 }
 0x372   : > { %v1189_v54 = vpop.xlane.xlu2 %1188 }
 0x373   : > { %3684 = vrcp.f32 %v1189_v54  ;;  %1567 = vmatpush.bf16.msrb.mxu3 %v3458_v49  ;;  %v3452_v54 = vld [vmem:[#allocation13] sm:$0xff] }
 0x374   : > { %v3123_v49 = vld [vmem:[#allocation7 + $0x210] sm:$0xf] }
 0x377   : > { %1568 = vmatpush.bf16.msrb.mxu3 %v3457_v50  ;;  %v3481_v50 = vld [vmem:[#allocation7 + $0x224] sm:$0xf0] }
 0x379   : > { %v3685_v56 = vpop.eup %3684 }
 0x37a   : > { %v1191_v57 = vmul.f32 %v3685_v56, %v3681_v38 }
 0x37b   : > { %1569 = vmatpush.bf16.msrb.mxu3 %v3456_v51  ;;  %v3478_v51 = vld [vmem:[#allocation7 + $0x214] sm:$0xf] }
 0x37c   : > { %v1192_v58 = vpack.c.bf16 %v1191_v57, %v1191_v57 }
 0x37e   : > { %2920 = vmatmul.msk.bf16.vlgmr.msra.gmra.mxu3 %vm1130_vm5, %v1192_v58 }
 0x37f   : > { %1570 = vmatpush.bf16.msrb.mxu3 %v3455_v52  ;;  %v3124_v52 = vor.u32 %v3481_v50, %v3123_v49 }
 0x383   : > { %1571 = vmatpush.bf16.msrb.mxu3 %v3454_v53  ;;  %v3125_v53 = vld [vmem:[#allocation7 + $0x228] sm:$0xf0] }
 0x387   : > { %1572 = vmatpush.bf16.msrb.mxu3 %v3453_v39  ;;  %v3203_v39 = vld [vmem:[#allocation7 + $0x2a8] sm:$0xf] }
 0x38b   : > { %1573 = vmatpush.bf16.msrb.mxu3 %v3452_v54  ;;  %v3500_v54 = vld [vmem:[#allocation7 + $0x2bc] sm:$0xf0] }
 0x3f1   : > { %v1160_v1 = vpop.f32.mrf.mxu3 }
 0x3f2   : > { %v1245_v2 = vpack.c.bf16 %v1160_v1, %v1160_v1 }
 0x3f4   : > { %1355 = vmatmul.bf16.vlgmr.msra.gmra.mxu0 %v1245_v2 }
 0x3f9   : > { %v1162_v4 = vpop.f32.mrf.mxu3 }
 0x401   : > { %v1209_v5 = vpop.f32.mrf.mxu3 }
 0x402   : > { %v1246_v6 = vpack.c.bf16 %v1209_v5, %v1209_v5 }
 0x404   : > { %1368 = vmatmul.bf16.vlgmr.msra.gmra.mxu1 %v1246_v6  ;;  %v3666_v6 = vld [vmem:[%s4391_s14] ss:$0 sm:$0xff] }
 0x409   : > { %v1211_v7 = vpop.f32.mrf.mxu3 }
 0x471   : > { %v1356_v8 = vpop.f32.mrf.mxu0 }
 0x472   : > { %v1357_v11 = vadd.f32 %v3662_v10, %v1356_v8 }
 0x479   : > { %v1358_v9 = vpop.f32.mrf.mxu0 }
 0x481   : > { %v1369_v12 = vpop.f32.mrf.mxu1 }
 0x482   : > { %v1370_v13 = vadd.f32 %v1369_v12, %v1357_v11  ;;  %v3219_v12 = vld [vmem:[#allocation7 + $0x2d0] sm:$0xf] }
 0x484   : > { %v1373_v14 = vadd.f32 %v1370_v13, %v4247_v45  ;;  %v3447_v45 = vld [vmem:[#allocation11 + $0x18] sm:$0xff] }
 0x485   : > { %1479 = vmatpush.bf16.msrb.mxu2 %v3447_v45  ;;  %v3505_v13 = vld [vmem:[#allocation7 + $0x2e4] sm:$0xf0]  ;;  %v3490_v45 = vld [vmem:[#allocation7 + $0x274] sm:$0xf] }
 0x486   : > { %v1376_v15 = vmul.f32 %v4238_v3, %v1373_v14 }
 0x488   : > { %1377 = vadd.xlane.f32.xlu0 %v1376_v15  ;;  %v3220_v15 = vor.u32 %v3505_v13, %v3219_v12  ;;  %v3077_v13 = vld [vmem:[#allocation7 + $0x1c8] sm:$0xf0] }
 0x489   : > { %v1371_v16 = vpop.f32.mrf.mxu1  ;;  %1480 = vmatpush.bf16.msrb.mxu2 %v3446_v27  ;;  %v3173_v27 = vld [vmem:[#allocation7 + $0x288] sm:$0xf0] }
 0x48a   : > { %v3221_v16 = vld [vmem:[#allocation7 + $0x2e8] sm:$0xf0]  ;;  %1917 = vmatpush.bf16.msrb.mxu0 %v3220_v15  ;;  %v3488_v15 = vld [vmem:[#allocation7 + $0x25c] sm:$0xf0] }
 0x48d   : > { %1481 = vmatpush.bf16.msrb.mxu2 %v3445_v28  ;;  %v3227_v28 = vld [vmem:[#allocation7 + $0x2d8] sm:$0xf] }
 0x491   : > { %1482 = vmatpush.bf16.msrb.mxu2 %v3444_v29  ;;  %v3506_v29 = vld [vmem:[#allocation7 + $0x2ec] sm:$0xf0] }
 0x492   : > { %v3228_v30 = vor.u32 %v3506_v29, %v3227_v28 }
 0x495   : > { %1943 = vmatpush.bf16.msra.mxu2 %v3228_v30  ;;  %v3479_v30 = vld [vmem:[#allocation7 + $0x21c] sm:$0xf] }
 0x4fb   : > { %v1378_v18 = vpop.xlane.xlu0 %1377 }
 0x4fc   : > { %v1379_v20 = vmul.f32 0.03125, %v1378_v18  ;;  %v3499_v18 = vld [vmem:[#allocation7 + $0x2b4] sm:$0xf0] }
 0x4fe   : > { %v1380_v21 = vsub.f32 %v1373_v14, %v1379_v20  ;;  %v3502_v14 = vld [vmem:[#allocation7 + $0x2d4] sm:$0xf] }
 0x4ff   : > { %v3224_v20 = vor.u32 %v3502_v14, %v3221_v16  ;;  %v3155_v14 = vld [vmem:[#allocation7 + $0x248] sm:$0xf] }
 0x500   : > { %v1381_v22 = vmul.f32 %v4238_v3, %v1380_v21  ;;  %v3496_v21 = vld [vmem:[#allocation7 + $0x2a4] sm:$0xf] }
 0x501   : > { %1930 = vmatpush.bf16.msrb.mxu1 %v3224_v20  ;;  %v3157_v20 = vld [vmem:[#allocation7 + $0x260] sm:$0xf0] }
 0x502   : > { %v1382_v23 = vmul.f32 %v1381_v22, %v1381_v22 }
 0x504   : > { %1383 = vadd.xlane.f32.xlu1 %v1382_v23  ;;  %v3196_v23 = vor.u32 %v3499_v18, %v3195_v17  ;;  %v3156_v17 = vor.u32 %v3488_v15, %v3155_v14  ;;  %v3485_v18 = vld [vmem:[#allocation7 + $0x24c] sm:$0xf]  ;;  %v3139_v14 = vld [vmem:[#allocation7 + $0x220] sm:$0xf]  ;;  %v3483_v15 = vld [vmem:[#allocation7 + $0x234] sm:$0xf0] }
 0x506   : > { %1918 = vmatpush.bf16.msrb.mxu0 %v3196_v23  ;;  %v3463_v23 = vld [vmem:[#allocation7 + $0x194] sm:$0xf0] }
 0x577   : > { %v1384_v31 = vpop.xlane.xlu1 %1383 }
 0x578   : > { %v1385_v32 = vmul.f32 0.03125, %v1384_v31  ;;  %v3503_v31 = vld [vmem:[#allocation7 + $0x2dc] sm:$0xf] }
 0x57a   : > { %v1386_v33 = vadd.f32 1e-12, %v1385_v32  ;;  %v3229_v32 = vld [vmem:[#allocation7 + $0x2f0] sm:$0xf0] }
 0x57c   : > { %3686 = vrsqrt.f32 %v1386_v33  ;;  %vm1393_vm7 = vweird.f32 %v1386_v33 }
 0x582   : > { %v3687_v34 = vpop.eup %3686 }
 0x583   : > { %v1388_v35 = vmul.f32 %v3687_v34, %v1386_v33  ;;  %vm1394_vm6 = vweird.f32 %v3687_v34  ;;  %v3172_v33 = vor.u32 %v3493_v26, %v3171_v25  ;;  %v3053_v26 = vld [vmem:[#allocation7 + $0x198] sm:$0xf0] }
 0x584   : > { %vm1395_vm8 = vmor %vm1393_vm7, %vm1394_vm6 }
 0x585   : > { %v1389_v36 = vmul.f32 %v3687_v34, %v1388_v35  ;;  %v3176_v35 = vor.u32 %v3490_v45, %v3173_v27  ;;  %1919 = vmatpush.bf16.msrb.mxu0 %v3172_v33  ;;  %v3131_v45 = vld [vmem:[#allocation7 + $0x218] sm:$0xf]  ;;  %v3482_v27 = vld [vmem:[#allocation7 + $0x22c] sm:$0xf0] }
 0x586   : > { %v3132_v29 = vor.u32 %v3482_v27, %v3131_v45 }
 0x587   : > { %v1390_v37 = vmul.f32 0.5, %v1389_v36  ;;  %v3147_v36 = vld [vmem:[#allocation7 + $0x240] sm:$0xf] }
 0x589   : > { %v1391_v38 = vsub.f32 1.5, %v1390_v37  ;;  %v3487_v37 = vld [vmem:[#allocation7 + $0x254] sm:$0xf0] }
 0x58b   : > { %v1392_v40 = vmul.f32 %v3687_v34, %v1391_v38  ;;  %v3484_v38 = vld [vmem:[#allocation7 + $0x244] sm:$0xf] }
 0x58d   : > { %v1396_v42 = vsel %vm1395_vm8, %v3687_v34, %v1392_v40  ;;  %v3232_v34 = vor.u32 %v3503_v31, %v3229_v32  ;;  %v3149_v40 = vld [vmem:[#allocation7 + $0x258] sm:$0xf0]  ;;  %v3133_v31 = vld [vmem:[#allocation7 + $0x230] sm:$0xf0]  ;;  %v3235_v32 = vld [vmem:[#allocation7 + $0x2e0] sm:$0xf] }
 0x58e   : > { %v1397_v43 = vmul.f32 %v1396_v42, %v1381_v22  ;;  %v3197_v22 = vld [vmem:[#allocation7 + $0x2b8] sm:$0xf0]  ;;  %v3152_v42 = vor.u32 %v3484_v38, %v3149_v40  ;;  %v3136_v33 = vor.u32 %v3479_v30, %v3133_v31  ;;  %v3107_v40 = vld [vmem:[#allocation7 + $0x1e8] sm:$0xf]  ;;  %v3468_v31 = vld [vmem:[#allocation7 + $0x1c4] sm:$0xf] }
 0x58f   : > { %v3200_v24 = vor.u32 %v3496_v21, %v3197_v22  ;;  %1956 = vmatpush.bf16.msra.mxu3 %v3232_v34  ;;  %v3160_v21 = vor.u32 %v3485_v18, %v3157_v20  ;;  %v3051_v22 = vld [vmem:[#allocation7 + $0x180] sm:$0xf]  ;;  %v3507_v34 = vld [vmem:[#allocation7 + $0x2f4] sm:$0xf0]  ;;  %v3141_v18 = vld [vmem:[#allocation7 + $0x238] sm:$0xf0] }
 0x590   : > { %v1401_v46 = vmul.f32 %v3663_v41, %v1397_v43  ;;  %v3148_v41 = vor.u32 %v3487_v37, %v3147_v36  ;;  %v3052_v25 = vor.u32 %v3463_v23, %v3051_v22  ;;  %v3237_v36 = vld [vmem:[#allocation7 + $0x2f8] sm:$0xf0]  ;;  %v3236_v37 = vor.u32 %v3507_v34, %v3235_v32  ;;  %v3115_v22 = vld [vmem:[#allocation7 + $0x1f0] sm:$0xf]  ;;  %v3477_v23 = vld [vmem:[#allocation7 + $0x204] sm:$0xf0] }
 0x591   : > { %1931 = vmatpush.bf16.msrb.mxu1 %v3200_v24  ;;  %v3460_v24 = vld [vmem:[#allocation7 + $0x184] sm:$0xf]  ;;  %v3116_v45 = vor.u32 %v3477_v23, %v3115_v22  ;;  %v3093_v32 = vld [vmem:[#allocation7 + $0x1d8] sm:$0xf0] }
 0x592   : > { %v1405_v47 = vadd.f32 %v3664_v44, %v1401_v46  ;;  %1920 = vmatpush.bf16.msrb.mxu0 %v3148_v41  ;;  %v3056_v28 = vor.u32 %v3460_v24, %v3053_v26  ;;  %v3476_v41 = vld [vmem:[#allocation7 + $0x1fc] sm:$0xf0]  ;;  %v3474_v24 = vld [vmem:[#allocation7 + $0x1f4] sm:$0xf]  ;;  %v3117_v26 = vld [vmem:[#allocation7 + $0x208] sm:$0xf0]  ;;  %v3096_v34 = vor.u32 %v3468_v31, %v3093_v32 }
 0x593   : > { %v3120_v27 = vor.u32 %v3474_v24, %v3117_v26 }
 0x594   : > { %v1422_v48 = vpack.c.bf16 %v1405_v47, %v1405_v47 }
 0x595   : > { %1932 = vmatpush.bf16.msrb.mxu1 %v3176_v35  ;;  %v3504_v35 = vld [vmem:[#allocation7 + $0x2e4] sm:$0xf] }
 0x596   : > { %1483 = vmatmul.bf16.vlgmr.msrb.gmra.mxu2 %v1422_v48  ;;  %1921 = vmatpush.bf16.msrb.mxu0 %v3124_v52  ;;  %v3240_v38 = vor.u32 %v3504_v35, %v3237_v36  ;;  %v3213_v52 = vld [vmem:[#allocation7 + $0x2c8] sm:$0xf0]  ;;  %v3067_v35 = vld [vmem:[#allocation7 + $0x190] sm:$0xf]  ;;  %v3465_v36 = vld [vmem:[#allocation7 + $0x1a4] sm:$0xf0] }
 0x599   : > { %1933 = vmatpush.bf16.msrb.mxu1 %v3152_v42  ;;  %v3473_v42 = vld [vmem:[#allocation7 + $0x1ec] sm:$0xf] }
 0x619   : > { %v1484_v56 = vpop.f32.mrf.mxu2 }
 0x61a   : > { %v1485_v57 = vadd.f32 %v3665_v55, %v1484_v56  ;;  %v3128_v55 = vor.u32 %v3478_v51, %v3125_v53  ;;  %v3204_v56 = vor.u32 %v3500_v54, %v3203_v39  ;;  %v3498_v51 = vld [vmem:[#allocation7 + $0x2b4] sm:$0xf]  ;;  %v3083_v39 = vld [vmem:[#allocation7 + $0x1b8] sm:$0xf]  ;;  %v3470_v54 = vld [vmem:[#allocation7 + $0x1cc] sm:$0xf0] }
 0x61b   : > { %v3216_v53 = vor.u32 %v3498_v51, %v3213_v52  ;;  %v3668_v52 = vld [vmem:[%s4393_s16] ss:$0 sm:$0xff] }
 0x61c   : > { %v1488_v58 = vmul.f32 %v1485_v57, %v1485_v57  ;;  %1934 = vmatpush.bf16.msrb.mxu1 %v3128_v55  ;;  %1944 = vmatpush.bf16.msra.mxu2 %v3204_v56  ;;  %v3467_v55 = vld [vmem:[#allocation7 + $0x1bc] sm:$0xf]  ;;  %v3084_v56 = vor.u32 %v3470_v54, %v3083_v39 }
 0x61e   : > { %v1489_v59 = vmul.f32 %v1488_v58, %v1485_v57  ;;  %v3205_v58 = vld [vmem:[#allocation7 + $0x2c0] sm:$0xf0] }
 0x620   : > { %v1490_v60 = vmul.f32 0.044715, %v1489_v59 }
 0x621   : > { %v1486_v61 = vpop.f32.mrf.mxu2 }
 0x622   : > { %v1491_v62 = vadd.f32 %v1490_v60, %v1485_v57  ;;  %v3099_v60 = vld [vmem:[#allocation7 + $0x1e0] sm:$0xf]  ;;  %v3475_v61 = vld [vmem:[#allocation7 + $0x1f4] sm:$0xf0] }
 0x624   : > { %v1492_v63 = vmul.f32 0.7978846, %v1491_v62  ;;  %v3472_v62 = vld [vmem:[#allocation7 + $0x1e4] sm:$0xf] }
 0x626   : > { %3688 = vtanh.f32 %v1492_v63  ;;  %v3100_v63 = vor.u32 %v3475_v61, %v3099_v60 }
 0x628   : > { %1922 = vmatpush.bf16.msrb.mxu0 %v3100_v63  ;;  %v3189_v63 = vld [vmem:[#allocation7 + $0x298] sm:$0xf0] }
 0x62c   : > { %v3689_v0 = vpop.eup %3688 }
 0x62d   : > { %v1494_v1 = vadd.f32 1.0, %v3689_v0  ;;  %v3101_v0 = vld [vmem:[#allocation7 + $0x1f8] sm:$0xf0] }
 0x62f   : > { %v1495_v2 = vmul.f32 0.5, %v1494_v1  ;;  %v3179_v1 = vld [vmem:[#allocation7 + $0x278] sm:$0xf] }
 0x631   : > { %v1496_v4 = vmul.f32 %v1495_v2, %v1485_v57  ;;  %v3497_v57 = vld [vmem:[#allocation7 + $0x2ac] sm:$0xf]  ;;  %v3494_v2 = vld [vmem:[#allocation7 + $0x28c] sm:$0xf0] }
 0x632   : > { %v3208_v59 = vor.u32 %v3497_v57, %v3205_v58  ;;  %v3085_v57 = vld [vmem:[#allocation7 + $0x1d0] sm:$0xf0]  ;;  %v3187_v58 = vld [vmem:[#allocation7 + $0x280] sm:$0xf] }
 0x633   : > { %v1513_v5 = vpack.c.bf16 %v1496_v4, %v1496_v4  ;;  %v3104_v4 = vor.u32 %v3472_v62, %v3101_v0  ;;  %v3088_v60 = vor.u32 %v3467_v55, %v3085_v57  ;;  %v3492_v62 = vld [vmem:[#allocation7 + $0x284] sm:$0xf] }
 0x634   : > { %1957 = vmatpush.bf16.msra.mxu3 %v3208_v59  ;;  %v3495_v59 = vld [vmem:[#allocation7 + $0x294] sm:$0xf0]  ;;  %v3192_v0 = vor.u32 %v3492_v62, %v3189_v63 }
 0x635   : > { %1574 = vmatmul.bf16.vlgmr.msrb.gmra.mxu3 %v1513_v5  ;;  %v3180_v5 = vor.u32 %v3494_v2, %v3179_v1  ;;  %1935 = vmatpush.bf16.msrb.mxu1 %v3104_v4  ;;  %v3188_v61 = vor.u32 %v3495_v59, %v3187_v58  ;;  %v3059_v1 = vld [vmem:[#allocation7 + $0x188] sm:$0xf]  ;;  %v3464_v2 = vld [vmem:[#allocation7 + $0x19c] sm:$0xf0]  ;;  %v3461_v4 = vld [vmem:[#allocation7 + $0x18c] sm:$0xf] }
 0x636   : > { %v1663_v58 = vld [vmem:[#allocation8 + $0x6] sm:$0x3f] }
 0x637   : > { %1945 = vmatpush.bf16.msra.mxu2 %v3180_v5  ;;  %v3060_v5 = vor.u32 %v3464_v2, %v3059_v1  ;;  %v1667_v59 = vperm.slane %v1663_v58, 2  ;;  %v1665_v2 = vperm.slane %v1663_v58, 0  ;;  %v1666_v23 = vperm.slane %v1663_v58, 1 }
 0x63b   : > { %1946 = vmatpush.bf16.msra.mxu2 %v3156_v17  ;;  %v3140_v17 = vor.u32 %v3483_v15, %v3139_v14 }
 0x63f   : > { %1947 = vmatpush.bf16.msra.mxu2 %v3132_v29  ;;  %v3471_v29 = vld [vmem:[#allocation7 + $0x1d4] sm:$0xf0] }
 0x6b8   : > { %v1575_v7 = vpop.f32.mrf.mxu3 }
 0x6b9   : > { %v1576_v8 = vadd.f32 %v3666_v6, %v1575_v7  ;;  %v3491_v6 = vld [vmem:[#allocation7 + $0x27c] sm:$0xf]  ;;  %v3181_v7 = vld [vmem:[#allocation7 + $0x290] sm:$0xf0] }
 0x6bb   : > { %v1579_v9 = vadd.f32 %v1576_v8, %v1405_v47  ;;  %v3184_v8 = vor.u32 %v3491_v6, %v3181_v7  ;;  %v3061_v6 = vld [vmem:[#allocation7 + $0x1a0] sm:$0xf0]  ;;  %v3163_v7 = vld [vmem:[#allocation7 + $0x250] sm:$0xf] }
 0x6bd   : > { %v1582_v10 = vmul.f32 %v4238_v3, %v1579_v9  ;;  %1958 = vmatpush.bf16.msra.mxu3 %v3184_v8  ;;  %v3489_v8 = vld [vmem:[#allocation7 + $0x264] sm:$0xf0] }
 0x6bf   : > { %1583 = vadd.xlane.f32.xlu2 %v1582_v10  ;;  %v3469_v10 = vld [vmem:[#allocation7 + $0x1c4] sm:$0xf0] }
 0x6c0   : > { %v1577_v11 = vpop.f32.mrf.mxu3 }
 0x6c1   : > { %v3466_v11 = vld [vmem:[#allocation7 + $0x1b4] sm:$0xf]  ;;  %1959 = vmatpush.bf16.msra.mxu3 %v3160_v21 }
 0x6c2   : > { %v3080_v16 = vor.u32 %v3466_v11, %v3077_v13  ;;  %v3486_v11 = vld [vmem:[#allocation7 + $0x254] sm:$0xf] }
 0x6c4   : > { %1936 = vmatpush.bf16.msrb.mxu1 %v3080_v16  ;;  %v3480_v16 = vld [vmem:[#allocation7 + $0x224] sm:$0xf] }
 0x6c5   : > { %1960 = vmatpush.bf16.msra.mxu3 %v3136_v33  ;;  %v3144_v21 = vor.u32 %v3480_v16, %v3141_v18 }
 0x6c8   : > { %1937 = vmatpush.bf16.msrb.mxu1 %v3056_v28  ;;  %v3091_v28 = vld [vmem:[#allocation7 + $0x1c0] sm:$0xf] }
 0x6c9   : > { %v3092_v33 = vor.u32 %v3471_v29, %v3091_v28 }
 0x6cc   : > { %1982 = vmatpush.bf16.msra.mxu1 %v3240_v38  ;;  %v3069_v38 = vld [vmem:[#allocation7 + $0x1a8] sm:$0xf0] }
 0x6d0   : > { %1983 = vmatpush.bf16.msra.mxu1 %v3216_v53 }
 0x6d4   : > { %1984 = vmatpush.bf16.msra.mxu1 %v3192_v0 }
 0x732   : > { %v1584_v43 = vpop.xlane.xlu2 %1583 }
 0x733   : > { %v1585_v44 = vmul.f32 0.03125, %v1584_v43  ;;  %v3108_v43 = vor.u32 %v3476_v41, %v3107_v40  ;;  %v3068_v40 = vor.u32 %v3465_v36, %v3067_v35 }
 0x735   : > { %v1586_v46 = vsub.f32 %v1579_v9, %v1585_v44  ;;  %v3075_v9 = vld [vmem:[#allocation7 + $0x1b0] sm:$0xf]  ;;  %v3109_v44 = vld [vmem:[#allocation7 + $0x200] sm:$0xf0]  ;;  %1948 = vmatpush.bf16.msra.mxu2 %v3108_v43 }
 0x736   : > { %v3076_v12 = vor.u32 %v3469_v10, %v3075_v9  ;;  %v3112_v49 = vor.u32 %v3473_v42, %v3109_v44  ;;  %v3064_v9 = vor.u32 %v3461_v4, %v3061_v6  ;;  %v3164_v10 = vor.u32 %v3489_v8, %v3163_v7 }
 0x737   : > { %v4287_v47 = vmul.f32 %v4238_v3, %v1586_v46  ;;  %v3211_v46 = vld [vmem:[#allocation7 + $0x2b0] sm:$0xf]  ;;  %v1669_v7 = vperm.slane %v1663_v58, 4  ;;  %v1670_v8 = vperm.slane %v1663_v58, 5 }
 0x738   : > { %1923 = vmatpush.bf16.msrb.mxu0 %v3076_v12  ;;  %1961 = vmatpush.bf16.msra.mxu3 %v3112_v49  ;;  %v3165_v12 = vld [vmem:[#allocation7 + $0x268] sm:$0xf0] }
 0x739   : > { %v1588_v48 = vmul.f32 %v4287_v47, %v4287_v47  ;;  %1949 = vmatpush.bf16.msra.mxu2 %v3084_v56  ;;  %v3168_v13 = vor.u32 %v3486_v11, %v3165_v12 }
 0x73b   : > { %1589 = vadd.xlane.f32.xlu0 %v1588_v48  ;;  %v3501_v48 = vld [vmem:[#allocation7 + $0x2c4] sm:$0xf0]  ;;  %1985 = vmatpush.bf16.msra.mxu1 %v3168_v13 }
 0x73c   : > { %1924 = vmatpush.bf16.msrb.mxu0 %v3052_v25  ;;  %v3212_v50 = vor.u32 %v3501_v48, %v3211_v46  ;;  %1962 = vmatpush.bf16.msra.mxu3 %v3088_v60  ;;  %v1668_v60 = vperm.slane %v1663_v58, 3  ;;  %v3511_v58 = vld [vmem:[#allocation10 + $0x98] sm:$0xff] }
 0x73d   : > { %1950 = vmatpush.bf16.msra.mxu2 %v3060_v5 }
 0x73f   : > { %1986 = vmatpush.bf16.msra.mxu1 %v3144_v21 }
 0x740   : > { %1969 = vmatpush.bf16.msra.mxu0 %v3236_v37  ;;  %1963 = vmatpush.bf16.msra.mxu3 %v3064_v9  ;;  %v3462_v37 = vld [vmem:[#allocation7 + $0x194] sm:$0xf] }
 0x741   : > { %v3072_v41 = vor.u32 %v3462_v37, %v3069_v38 }
 0x743   : > { %1987 = vmatpush.bf16.msra.mxu1 %v3120_v27 }
 0x744   : > { %1970 = vmatpush.bf16.msra.mxu0 %v3212_v50  ;;  %v3667_v50 = vld [vmem:[%s4392_s15] ss:$0 sm:$0xff] }
 0x747   : > { %1988 = vmatpush.bf16.msra.mxu1 %v3096_v34 }
 0x748   : > { %1971 = vmatpush.bf16.msra.mxu0 %v3188_v61 }
 0x74b   : > { %1989 = vmatpush.bf16.msra.mxu1 %v3072_v41 }
 0x74c   : > { %1972 = vmatpush.bf16.msra.mxu0 %v3164_v10 }
 0x750   : > { %1973 = vmatpush.bf16.msra.mxu0 %v3140_v17 }
 0x754   : > { %1974 = vmatpush.bf16.msra.mxu0 %v3116_v45 }
 0x758   : > { %1975 = vmatpush.bf16.msra.mxu0 %v3092_v33 }
 0x75c   : > { %1976 = vmatpush.bf16.msra.mxu0 %v3068_v40 }
 0x7ae   : > { %v1590_v20 = vpop.xlane.xlu0 %1589 }
 0x7af   : > { %v1591_v25 = vmul.f32 0.03125, %v1590_v20 }
 0x7b1   : > { %v1592_v30 = vadd.f32 1e-12, %v1591_v25 }
 0x7b3   : > { %3690 = vrsqrt.f32 %v1592_v30  ;;  %vm1599_vm10 = vweird.f32 %v1592_v30 }
 0x7b9   : > { %v3691_v42 = vpop.eup %3690 }
 0x7ba   : > { %v1594_v43 = vmul.f32 %v3691_v42, %v1592_v30  ;;  %vm1600_vm9 = vweird.f32 %v3691_v42 }
 0x7bb   : > { %vm1601_vm11 = vmor %vm1599_vm10, %vm1600_vm9 }
 0x7bc   : > { %v1595_v44 = vmul.f32 %v3691_v42, %v1594_v43 }
 0x7be   : > { %v1596_v46 = vmul.f32 0.5, %v1595_v44 }
 0x7c0   : > { %v1597_v48 = vsub.f32 1.5, %v1596_v46 }
 0x7c2   : > { %v1598_v49 = vmul.f32 %v3691_v42, %v1597_v48  ;;  %v3523_v48 = vld [vmem:[#allocation10 + $0xf8] sm:$0xff] }
 0x7c4   : > { %v1602_v51 = vsel %vm1601_vm11, %v3691_v42, %v1598_v49  ;;  %v3514_v49 = vld [vmem:[#allocation10 + $0xb0] sm:$0xff] }
 0x7c5   : > { %v1603_v53 = vmul.f32 %v1602_v51, %v4287_v47 }
 0x7c7   : > { %v1607_v39 = vmul.f32 %v3667_v50, %v1603_v53  ;;  %v3522_v50 = vld [vmem:[#allocation10 + $0xf0] sm:$0xff]  ;;  %v3521_v53 = vld [vmem:[#allocation10 + $0xe8] sm:$0xff] }
 0x7c9   : > { %v4298_v54 = vadd.f32 %v3668_v52, %v1607_v39  ;;  %v3513_v52 = vld [vmem:[#allocation10 + $0xa8] sm:$0xff]  ;;  %v3512_v39 = vld [vmem:[#allocation10 + $0xa0] sm:$0xff] }
 0x7cb   : > { %v1661_v55 = vpack.c.bf16 %v4298_v54, %v4298_v54 }
 0x7cd   : > { %1925 = vmatmul.bf16.vlgmr.msrb.gmra.mxu0 %v1661_v55  ;;  %1938 = vmatmul.bf16.vlgmr.msrb.gmra.mxu1 %v1661_v55 }
 0x7ce   : > { %1951 = vmatmul.bf16.vlgmr.msra.gmra.mxu2 %v1661_v55  ;;  %1964 = vmatmul.bf16.vlgmr.msra.gmra.mxu3 %v1661_v55 }
 0x7cf   : > { %2242 = vmatpush.bf16.msrb.mxu1 %v3523_v48 }
 0x7d3   : > { %2243 = vmatpush.bf16.msrb.mxu1 %v3522_v50 }
 0x7d7   : > { %2244 = vmatpush.bf16.msrb.mxu1 %v3521_v53  ;;  %v3538_v53 = vld [vmem:[#allocation13 + $0x70] sm:$0xff] }
 0x7dd   : > { %1977 = vmatmul.bf16.vlgmr.msra.gmra.mxu0 %v1661_v55  ;;  %1990 = vmatmul.bf16.vlgmr.msra.gmra.mxu1 %v1661_v55 }
 0x84a   : > { %v1926_v56 = vpop.f32.mrf.mxu0  ;;  %v1939_v57 = vpop.f32.mrf.mxu1 }
 0x84b   : > { %v1927_v6 = vadd.f32 %v1926_v56, %v1665_v2  ;;  %v1940_v24 = vadd.f32 %v1939_v57, %v1666_v23  ;;  %v3519_v2 = vld [vmem:[#allocation10 + $0xd8] sm:$0xff] }
 0x84c   : > { %v3531_v23 = vld [vmem:[#allocation11 + $0x78] sm:$0xff] }
 0x84d   : > { %v1995_v13 = vpack.c.bf16 %v1927_v6, %v1927_v6  ;;  %v2044_v25 = vpack.c.bf16 %v1940_v24, %v1940_v24  ;;  %v3516_v6 = vld [vmem:[#allocation10 + $0xc0] sm:$0xff] }
 0x851   : > { %v1952_v61 = vpop.f32.mrf.mxu2  ;;  %v1965_v62 = vpop.f32.mrf.mxu3 }
 0x852   : > { %v1953_v47 = vadd.f32 %v1952_v61, %v1667_v59  ;;  %v1966_v63 = vadd.f32 %v1965_v62, %v1668_v60  ;;  %v1928_v0 = vpop.f32.mrf.mxu0  ;;  %v1941_v1 = vpop.f32.mrf.mxu1  ;;  %v3510_v59 = vld [vmem:[#allocation10 + $0x90] sm:$0xff]  ;;  %v3509_v61 = vld [vmem:[#allocation10 + $0x88] sm:$0xff] }
 0x853   : > { %v3508_v0 = vld [vmem:[#allocation10 + $0x80] sm:$0xff] }
 0x854   : > { %v1996_v4 = vpack.c.bf16 %v1953_v47, %v1953_v47  ;;  %v2045_v5 = vpack.c.bf16 %v1966_v63, %v1966_v63  ;;  %v3520_v1 = vld [vmem:[#allocation10 + $0xe0] sm:$0xff] }
 0x855   : > { %2245 = vmatpush.bf16.msrb.mxu1 %v3520_v1 }
 0x856   : > { %2004 = vmatpush.bf16.xpose.msrb.mxu2 %v1996_v4  ;;  %v3518_v4 = vld [vmem:[#allocation10 + $0xd0] sm:$0xff] }
 0x859   : > { %v1954_v9 = vpop.f32.mrf.mxu2  ;;  %v1967_v10 = vpop.f32.mrf.mxu3  ;;  %2246 = vmatpush.bf16.msrb.mxu1 %v3519_v2 }
 0x85a   : > { %v1978_v11 = vpop.f32.mrf.mxu0  ;;  %v1991_v12 = vpop.f32.mrf.mxu1 }
 0x85b   : > { %v1979_v14 = vadd.f32 %v1978_v11, %v1669_v7  ;;  %v1992_v15 = vadd.f32 %v1991_v12, %v1670_v8 }
 0x85d   : > { %v2024_v16 = vpack.c.bf16 %v1979_v14, %v1979_v14  ;;  %v2073_v17 = vpack.c.bf16 %v1992_v15, %v1992_v15  ;;  %2005 = vmatmul.bf16.vlgmr.msrb.gmra.mxu2 %v1995_v13  ;;  %2247 = vmatpush.bf16.msrb.mxu1 %v3518_v4  ;;  %v3669_v15 = vld [vmem:[%s4385_s8 + $0x1] ss:$0 sm:$0xff] }
 0x85e   : > { %2053 = vmatpush.bf16.xpose.msra.mxu2 %v2045_v5  ;;  %v3517_v5 = vld [vmem:[#allocation10 + $0xc8] sm:$0xff] }
 0x85f   : > { %v2029_v18 = vsel %vm1147_vm4, %v2024_v16, 0  ;;  %v2078_v20 = vsel %vm1147_vm4, %v2073_v17, 0 }
 0x860   : > { %2038 = vmatpush.bf16.msrb.mxu3 %v2029_v18 }
 0x861   : > { %2248 = vmatpush.bf16.msrb.mxu1 %v3517_v5 }
 0x862   : > { %v1980_v21 = vpop.f32.mrf.mxu0  ;;  %v1993_v22 = vpop.f32.mrf.mxu1 }
 0x864   : > { %2087 = vmatpush.bf16.msra.mxu3 %v2078_v20 }
 0x865   : > { %2249 = vmatpush.bf16.msrb.mxu1 %v3516_v6 }
 0x866   : > { %2361 = vmatpush.bf16.msrb.mxu2 %v3531_v23 }
 0x86d   : > { %2054 = vmatmul.bf16.vlgmr.msra.gmra.mxu2 %v2044_v25 }
 0x8e0   : > { %v2006_v26 = vpop.f32.mrf.mxu2 }
 0x8e1   : > { %v2010_v45 = vmul.f32 0.25, %v2006_v26 }
 0x8e3   : > { %v2011_v27 = vadd.f32 %v2010_v45, %v4257_v19 }
 0x8e5   : > { %v2012_v28 = vsel %vm1130_vm5, %v2011_v27, -inf }
 0x8e6   : > { %2013 = vmax.xlane.f32.xlu1 %v2012_v28  ;;  %v3530_v28 = vld [vmem:[#allocation11 + $0x70] sm:$0xff] }
 0x8e7   : > { %2362 = vmatpush.bf16.msrb.mxu2 %v3530_v28 }
 0x8e8   : > { %v2008_v29 = vpop.f32.mrf.mxu2 }
 0x8e9   : > { %v3529_v29 = vld [vmem:[#allocation11 + $0x68] sm:$0xff] }
 0x8eb   : > { %2363 = vmatpush.bf16.msrb.mxu2 %v3529_v29 }
 0x8f0   : > { %v2055_v30 = vpop.f32.mrf.mxu2 }
 0x8f1   : > { %v2059_v31 = vmul.f32 0.25, %v2055_v30  ;;  %v3528_v30 = vld [vmem:[#allocation11 + $0x60] sm:$0xff] }
 0x8f2   : > { %2364 = vmatpush.bf16.msrb.mxu2 %v3528_v30 }
 0x8f3   : > { %v2060_v32 = vadd.f32 %v2059_v31, %v4257_v19  ;;  %v3515_v19 = vld [vmem:[#allocation10 + $0xb8] sm:$0xff]  ;;  %v3526_v31 = vld [vmem:[#allocation11 + $0x50] sm:$0xff] }
 0x8f4   : > { %2229 = vmatpush.bf16.msrb.mxu0 %v3515_v19 }
 0x8f5   : > { %v2061_v33 = vsel %vm1130_vm5, %v2060_v32, -inf }
 0x8f6   : > { %2062 = vmax.xlane.f32.xlu2 %v2061_v33  ;;  %v3524_v33 = vld [vmem:[#allocation11 + $0x40] sm:$0xff] }
 0x8f8   : > { %v2057_v34 = vpop.f32.mrf.mxu2  ;;  %2230 = vmatpush.bf16.msrb.mxu0 %v3514_v49  ;;  %v3671_v49 = vld [vmem:[%s4387_s10 + $0x1] ss:$0 sm:$0xff] }
 0x8f9   : > { %v3539_v34 = vld [vmem:[#allocation13 + $0x78] sm:$0xff] }
 0x8fc   : > { %2231 = vmatpush.bf16.msrb.mxu0 %v3513_v52 }
 0x900   : > { %2232 = vmatpush.bf16.msrb.mxu0 %v3512_v39  ;;  %v3537_v39 = vld [vmem:[#allocation13 + $0x68] sm:$0xff] }
 0x904   : > { %2233 = vmatpush.bf16.msrb.mxu0 %v3511_v58  ;;  %v3533_v58 = vld [vmem:[#allocation13 + $0x48] sm:$0xff] }
 0x908   : > { %2234 = vmatpush.bf16.msrb.mxu0 %v3510_v59  ;;  %v3532_v59 = vld [vmem:[#allocation13 + $0x40] sm:$0xff] }
 0x90c   : > { %2235 = vmatpush.bf16.msrb.mxu0 %v3509_v61 }
 0x910   : > { %2236 = vmatpush.bf16.msrb.mxu0 %v3508_v0 }
 0x959   : > { %v2014_v35 = vpop.xlane.xlu1 %2013 }
 0x95a   : > { %v2015_v36 = vsub.f32 %v2011_v27, %v2014_v35 }
 0x95c   : > { %v2016_v37 = vmul.f32 1.442695, %v2015_v36 }
 0x95e   : > { %3692 = vpow2.f32 %v2016_v37 }
 0x964   : > { %v3693_v38 = vpop.eup %3692 }
 0x965   : > { %v2018_v40 = vsel %vm1130_vm5, %v3693_v38, 0.0 }
 0x966   : > { %2019 = vadd.xlane.f32.xlu0 %v2018_v40 }
 0x969   : > { %v2063_v41 = vpop.xlane.xlu2 %2062 }
 0x96a   : > { %v2064_v42 = vsub.f32 %v2060_v32, %v2063_v41  ;;  %v3525_v32 = vld [vmem:[#allocation11 + $0x48] sm:$0xff] }
 0x96c   : > { %v2065_v43 = vmul.f32 1.442695, %v2064_v42 }
 0x96e   : > { %3694 = vpow2.f32 %v2065_v43 }
 0x974   : > { %v3695_v44 = vpop.eup %3694 }
 0x975   : > { %v2067_v46 = vsel %vm1130_vm5, %v3695_v44, 0.0 }
 0x976   : > { %2068 = vadd.xlane.f32.xlu1 %v2067_v46  ;;  %v3670_v46 = vld [vmem:[%s4386_s9 + $0x1] ss:$0 sm:$0xff] }
 0x9d9   : > { %v2020_v51 = vpop.xlane.xlu0 %2019 }
 0x9da   : > { %3696 = vrcp.f32 %v2020_v51 }
 0x9e0   : > { %v3697_v55 = vpop.eup %3696 }
 0x9e1   : > { %v2022_v56 = vmul.f32 %v3697_v55, %v3693_v38  ;;  %v3536_v55 = vld [vmem:[#allocation13 + $0x60] sm:$0xff] }
 0x9e3   : > { %v2023_v57 = vpack.c.bf16 %v2022_v56, %v2022_v56  ;;  %v3535_v56 = vld [vmem:[#allocation13 + $0x58] sm:$0xff] }
 0x9e5   : > { %3241 = vmatmul.msk.bf16.vlgmr.msrb.gmra.mxu3 %vm1130_vm5, %v2023_v57  ;;  %v3534_v57 = vld [vmem:[#allocation13 + $0x50] sm:$0xff] }
 0x9e6   : > { %2454 = vmatpush.bf16.msrb.mxu3 %v3539_v34 }
 0x9e9   : > { %v2069_v60 = vpop.xlane.xlu1 %2068 }
 0x9ea   : > { %3698 = vrcp.f32 %v2069_v60  ;;  %2455 = vmatpush.bf16.msrb.mxu3 %v3538_v53  ;;  %v3672_v60 = vld [vmem:[%s4389_s12 + $0x1] ss:$0 sm:$0xff] }
 0x9ee   : > { %2456 = vmatpush.bf16.msrb.mxu3 %v3537_v39 }
 0x9f0   : > { %v3699_v62 = vpop.eup %3698 }
 0x9f1   : > { %v2071_v47 = vmul.f32 %v3699_v62, %v3695_v44 }
 0x9f2   : > { %2457 = vmatpush.bf16.msrb.mxu3 %v3536_v55 }
 0x9f3   : > { %v2072_v63 = vpack.c.bf16 %v2071_v47, %v2071_v47 }
 0x9f5   : > { %3242 = vmatmul.msk.bf16.vlgmr.msra.gmra.mxu3 %vm1130_vm5, %v2072_v63 }
 0x9f6   : > { %2458 = vmatpush.bf16.msrb.mxu3 %v3535_v56 }
 0x9fa   : > { %2459 = vmatpush.bf16.msrb.mxu3 %v3534_v57 }
 0x9fe   : > { %2460 = vmatpush.bf16.msrb.mxu3 %v3533_v58 }
 0xa02   : > { %2461 = vmatpush.bf16.msrb.mxu3 %v3532_v59 }
 0xa68   : > { %v2040_v7 = vpop.f32.mrf.mxu3 }
 0xa69   : > { %v2126_v8 = vpack.c.bf16 %v2040_v7, %v2040_v7 }
 0xa6b   : > { %2237 = vmatmul.bf16.vlgmr.msrb.gmra.mxu0 %v2126_v8 }
 0xa70   : > { %v2042_v9 = vpop.f32.mrf.mxu3 }
 0xa78   : > { %v2089_v10 = vpop.f32.mrf.mxu3 }
 0xa79   : > { %v2127_v11 = vpack.c.bf16 %v2089_v10, %v2089_v10  ;;  %v3673_v10 = vld [vmem:[%s4391_s14 + $0x1] ss:$0 sm:$0xff] }
 0xa7b   : > { %2250 = vmatmul.bf16.vlgmr.msrb.gmra.mxu1 %v2127_v11 }
 0xa80   : > { %v2091_v12 = vpop.f32.mrf.mxu3 }
 0xae8   : > { %v2238_v13 = vpop.f32.mrf.mxu0 }
 0xae9   : > { %v2239_v16 = vadd.f32 %v3669_v15, %v2238_v13 }
 0xaf0   : > { %v2240_v14 = vpop.f32.mrf.mxu0 }
 0xaf8   : > { %v2251_v17 = vpop.f32.mrf.mxu1 }
 0xaf9   : > { %v2252_v18 = vadd.f32 %v2251_v17, %v2239_v16  ;;  %v688_v16 = vld [vmem:[%s682_s26] sm:$0xff]  ;;  %v4014_v17 = vmov 0  }
 0xafa   : > { %3658 = vset.pattern.permute.xlu0 %v4014_v17  ;;  %3659 = vset.pattern.permute.xlu1 %v4014_v17 }
 0xafb   : > { %v2255_v20 = vadd.f32 %v2252_v18, %v4298_v54  ;;  %v3527_v54 = vld [vmem:[#allocation11 + $0x58] sm:$0xff]  ;;  %v2515_v18 = vsel %vm2514_vm15, %v688_v16, 0.0 }
 0xafc   : > { %2365 = vmatpush.bf16.msrb.mxu2 %v3527_v54 }
 0xafd   : > { %v2260_v21 = vmul.f32 %v4238_v3, %v2255_v20 }
 0xaff   : > { %2261 = vadd.xlane.f32.xlu2 %v2260_v21 }
 0xb00   : > { %v2253_v22 = vpop.f32.mrf.mxu1  ;;  %2366 = vmatpush.bf16.msrb.mxu2 %v3526_v31 }
 0xb04   : > { %2367 = vmatpush.bf16.msrb.mxu2 %v3525_v32 }
 0xb08   : > { %2368 = vmatpush.bf16.msrb.mxu2 %v3524_v33 }
 0xb72   : > { %v2262_v24 = vpop.xlane.xlu2 %2261 }
 0xb73   : > { %v2263_v25 = vmul.f32 0.03125, %v2262_v24 }
 0xb75   : > { %v2264_v26 = vsub.f32 %v2255_v20, %v2263_v25  ;;  %v2516_v20 = vrot.slane %v2515_v18, 4 }
 0xb77   : > { %v2265_v45 = vmul.f32 %v4238_v3, %v2264_v26  ;;  %v2517_v21 = vadd.f32 %v2516_v20, %v2515_v18 }
 0xb79   : > { %v2266_v27 = vmul.f32 %v2265_v45, %v2265_v45  ;;  %v2518_v22 = vrot.slane %v2517_v21, 2 }
 0xb7b   : > { %2267 = vadd.xlane.f32.xlu0 %v2266_v27  ;;  %v2519_v23 = vadd.f32 %v2518_v22, %v2517_v21 }
 0xb7d   : > { %v2520_v24 = vrot.slane %v2519_v23, 1 }
 0xb7f   : > { %v2521_v25 = vadd.f32 %v2520_v24, %v2519_v23 }
 0xb81   : > { %v2522_v26 = vmax.f32 %v2521_v25, 0.0001 }
 0xb8f   : > { %2504 = vperm.xlu0 %3658, %v688_v16  }
 0xbee   : > { %v2268_v35 = vpop.xlane.xlu0 %2267 }
 0xbef   : > { %v2269_v36 = vmul.f32 0.03125, %v2268_v35 }
 0xbf1   : > { %v2270_v37 = vadd.f32 1e-12, %v2269_v36 }
 0xbf3   : > { %3700 = vrsqrt.f32 %v2270_v37  ;;  %vm2277_vm13 = vweird.f32 %v2270_v37 }
 0xbf9   : > { %v3701_v38 = vpop.eup %3700 }
 0xbfa   : > { %v2272_v40 = vmul.f32 %v3701_v38, %v2270_v37  ;;  %vm2278_vm12 = vweird.f32 %v3701_v38 }
 0xbfb   : > { %vm2279_vm14 = vmor %vm2277_vm13, %vm2278_vm12 }
 0xbfc   : > { %v2273_v41 = vmul.f32 %v3701_v38, %v2272_v40 }
 0xbfe   : > { %v2274_v42 = vmul.f32 0.5, %v2273_v41  ;;  %v3674_v41 = vld [vmem:[%s4392_s15 + $0x1] ss:$0 sm:$0xff] }
 0xc00   : > { %v2275_v43 = vsub.f32 1.5, %v2274_v42 }
 0xc02   : > { %v2276_v44 = vmul.f32 %v3701_v38, %v2275_v43  ;;  %v3675_v43 = vld [vmem:[%s4393_s16 + $0x1] ss:$0 sm:$0xff] }
 0xc04   : > { %v2280_v19 = vsel %vm2279_vm14, %v3701_v38, %v2276_v44 }
 0xc05   : > { %v2281_v48 = vmul.f32 %v2280_v19, %v2265_v45  ;;  %v2505_v19 = vpop.permute.xlu0 %2504 }
 0xc07   : > { %v2285_v50 = vmul.f32 %v3670_v46, %v2281_v48 }
 0xc09   : > { %v2289_v51 = vadd.f32 %v3671_v49, %v2285_v50 }
 0xc0b   : > { %v2307_v52 = vpack.c.bf16 %v2289_v51, %v2289_v51 }
 0xc0d   : > { %2369 = vmatmul.bf16.vlgmr.msrb.gmra.mxu2 %v2307_v52 }
 0xc90   : > { %v2370_v61 = vpop.f32.mrf.mxu2 }
 0xc91   : > { %v2371_v62 = vadd.f32 %v3672_v60, %v2370_v61 }
 0xc93   : > { %v2374_v47 = vmul.f32 %v2371_v62, %v2371_v62 }
 0xc95   : > { %v2375_v63 = vmul.f32 %v2374_v47, %v2371_v62 }
 0xc97   : > { %v2376_v0 = vmul.f32 0.044715, %v2375_v63 }
 0xc98   : > { %v2372_v1 = vpop.f32.mrf.mxu2 }
 0xc99   : > { %v2377_v2 = vadd.f32 %v2376_v0, %v2371_v62 }
 0xc9b   : > { %v2378_v4 = vmul.f32 0.7978846, %v2377_v2 }
 0xc9d   : > { %3702 = vtanh.f32 %v2378_v4 }
 0xc9e   : > { %3704 = vrcp.f32 %v2522_v26 }
 0xca3   : > { %v3703_v5 = vpop.eup %3702 }
 0xca4   : > { %v2380_v6 = vadd.f32 1.0, %v3703_v5  ;;  %v3705_v45 = vpop.eup %3704 }
 0xca6   : > { %v2381_v7 = vmul.f32 0.5, %v2380_v6 }
 0xca8   : > { %v2382_v8 = vmul.f32 %v2381_v7, %v2371_v62 }
 0xcaa   : > { %v2400_v9 = vpack.c.bf16 %v2382_v8, %v2382_v8 }
 0xcac   : > { %2462 = vmatmul.bf16.vlgmr.msrb.gmra.mxu3 %v2400_v9 }
 0xd2f   : > { %v2463_v11 = vpop.f32.mrf.mxu3 }
 0xd30   : > { %v2464_v12 = vadd.f32 %v3673_v10, %v2463_v11 }
 0xd32   : > { %v2467_v13 = vadd.f32 %v2464_v12, %v2289_v51 }
 0xd34   : > { %v2472_v14 = vmul.f32 %v4238_v3, %v2467_v13 }
 0xd36   : > { %2473 = vadd.xlane.f32.xlu1 %v2472_v14 }
 0xd37   : > { %v2465_v15 = vpop.f32.mrf.mxu3 }
 0xd4f   : > { %2526 = vperm.xlu1 %3659, %v3705_v45  }
 0xda9   : > { %v2474_v27 = vpop.xlane.xlu1 %2473 }
 0xdaa   : > { %v2475_v28 = vmul.f32 0.03125, %v2474_v27 }
 0xdac   : > { %v2476_v29 = vsub.f32 %v2467_v13, %v2475_v28 }
 0xdae   : > { %v2477_v30 = vmul.f32 %v4238_v3, %v2476_v29 }
 0xdb0   : > { %v2478_v54 = vmul.f32 %v2477_v30, %v2477_v30 }
 0xdb2   : > { %2479 = vadd.xlane.f32.xlu2 %v2478_v54 }
 0xdc1   : > { %v2527_v55 = vpop.permute.xlu1 %2526 }
 0xe25   : > { %v2480_v31 = vpop.xlane.xlu2 %2479 }
 0xe26   : > { %v2481_v32 = vmul.f32 0.03125, %v2480_v31 }
 0xe28   : > { %v2482_v33 = vadd.f32 1e-12, %v2481_v32 }
 0xe2a   : > { %3706 = vrsqrt.f32 %v2482_v33  ;;  %vm2489_vm1 = vweird.f32 %v2482_v33 }
 0xe30   : > { %v3707_v34 = vpop.eup %3706 }
 0xe31   : > { %v2484_v35 = vmul.f32 %v3707_v34, %v2482_v33  ;;  %vm2490_vm0 = vweird.f32 %v3707_v34 }
 0xe32   : > { %vm2491_vm2 = vmor %vm2489_vm1, %vm2490_vm0 }
 0xe33   : > { %v2485_v36 = vmul.f32 %v3707_v34, %v2484_v35 }
 0xe35   : > { %v2486_v37 = vmul.f32 0.5, %v2485_v36 }
 0xe37   : > { %v2487_v38 = vsub.f32 1.5, %v2486_v37 }
 0xe39   : > { %v2488_v40 = vmul.f32 %v3707_v34, %v2487_v38 }
 0xe3b   : > { %v2492_v42 = vsel %vm2491_vm2, %v3707_v34, %v2488_v40 }
 0xe3c   : > { %v2493_v44 = vmul.f32 %v2492_v42, %v2477_v30 }
 0xe3e   : > { %v2497_v46 = vmul.f32 %v3674_v41, %v2493_v44 }
 0xe40   : > { %v2501_v48 = vadd.f32 %v3675_v43, %v2497_v46 }
 0xe42   : > { %v2507_v49 = vmul.f32 %v2505_v19, %v2501_v48 }
 0xe44   : > { %v2508_v50 = vrot.slane %v2507_v49, 4 }
 0xe46   : > { %v2509_v51 = vadd.f32 %v2508_v50, %v2507_v49 }
 0xe48   : > { %v2510_v52 = vrot.slane %v2509_v51, 2 }
 0xe4a   : > { %v2511_v53 = vadd.f32 %v2510_v52, %v2509_v51 }
 0xe4c   : > { %v2512_v39 = vrot.slane %v2511_v53, 1 }
 0xe4e   : > { %v2513_v56 = vadd.f32 %v2512_v39, %v2511_v53 }
 0xe50   : > { %v2529_v57 = vmul.f32 %v2527_v55, %v2513_v56 }
 0xe52   : > { %v2530_v58 = vmul.f32 %v2529_v57, %v2529_v57  ;;  %v2534_v4 = vmul.f32 %v4238_v3, %v2529_v57 }
 0xe54   : > { %v2531_v59 = vmul.f32 %v4238_v3, %v2530_v58 }
 0xe56   : > { %2532 = vadd.xlane.f32.xlu2 %v2531_v59 }
 0xec9   : > { %v2533_v60 = vpop.xlane.xlu2 %2532 }
 0xeca   : > { %v2535_v61 = vmax.f32 %v2533_v60, 1e-24 }
 0xecc   : > { %3708 = vrsqrt.f32 %v2535_v61  ;;  %vm2542_vm4 = vweird.f32 %v2535_v61 }
 0xed2   : > { %v3709_v62 = vpop.eup %3708 }
 0xed3   : > { %v2537_v47 = vmul.f32 %v3709_v62, %v2535_v61  ;;  %vm2543_vm3 = vweird.f32 %v3709_v62 }
 0xed4   : > { %vm2544_vm5 = vmor %vm2542_vm4, %vm2543_vm3 }
 0xed5   : > { %v2538_v63 = vmul.f32 %v3709_v62, %v2537_v47 }
 0xed7   : > { %v2539_v0 = vmul.f32 0.5, %v2538_v63 }
 0xed9   : > { %v2540_v1 = vsub.f32 1.5, %v2539_v0 }
 0xedb   : > { %v2541_v2 = vmul.f32 %v3709_v62, %v2540_v1 }
 0xedd   : > { %v2545_v5 = vsel %vm2544_vm5, %v3709_v62, %v2541_v2 }
 0xede   : > { %v2546_v6 = vmul.f32 %v2545_v5, %v2534_v4 }
 0xee0   : > { %2547 = vst [vmem:[%s674_s30] sm:$0x1] %v2546_v6 }
 0xee1   : > { %3947 = shalt.err (!%p3944_p8)
}
 0xee2   : > { %3568 = dma.vmem_to_hbm [thread:$0]  (%p4143_p5), %s2560_s21, 16, %s2562_s29, %s2549_s24  }
 0xee3 PF: > { %s4435_s19 = sld [smem:[#allocation23_spill]] }
 0xee4   : > { %s4436_s4 = sld [smem:[#allocation20_spill]] }
 0xee9   : > { %p3610_p9 = scmp.ge.s32.totalorder %s4435_s19, 2 }
 0xeea   : > { %s2573_s23 = sand.u32 1, %s4436_s4  }
 0xeeb   : > { %p3593_p10 = pnand %p3610_p9, %p4147_p6  ;;  %s2574_s0 = scalar_lea.sflag [#allocation4], %s2573_s23 }
 0xeed   : > { %p3594_p11 = pneg %p3593_p10 }
 0xeef   : > { %3981 = dma.done.wait (%p3594_p11), %s2574_s0, 16  }
 0xef0   : > { %3983 = vsyncadd (%p3594_p11), %s2574_s0, 4294967280  ;;  %s4438_s27 = sld [smem:[#allocation24_spill]] }
 0xef1   : > { %s4439_s24 = sld [smem:[#allocation21_spill]] }
 0xef2   : > { %s4440_s25 = sld [smem:[#allocation22_spill]] }
 0xef3   : > { %s4441_s26 = sld [smem:[#allocation25_spill]] }
 0xef6   : > { %p31_p12 = scmp.ge.s32.totalorder %s4438_s27, 6  }
 0xef8   :  { %33 = sbr.rel (!%p31_p12) target bundleno = 13 (0xd), region = 170 }
 0xefd   :  { %2579 = vsyncpa [#allocation3], 1 }
 0xefe   :  { %2581 = vsyncpa [#allocation3 + $0x1], 1 }
 0xeff   :  { %2582 = vsyncpa [#allocation6], 1 }
 0xf00   :  { %2583 = vsyncpa [#allocation9], 1 }
 0xf01   :  { %2584 = vsyncpa [#allocation12], 1 }
 0xf02   :  { %2585 = vsyncpa [#allocation4], 1 }
 0xf03   :  { %2587 = vsyncpa [#allocation4 + $0x1], 1 }

</bundles_post_ra>
